<compile_context>
chip_gen: v5e
topology: v5e:2x2
jax: 0.10.0
libtpu: 0.0.40
codegen_flags: <defaults>
</compile_context>

<pallas_src>
import functools

import jax
import jax.numpy as jnp
from jax.experimental import pallas as pl
from jax.experimental.pallas import tpu as pltpu

DIM = 128      # padded feature width (lane dimension)
IN_PAD = 16    # padded input width = one bf16 sublane tile (real inputs: 2)
OUT_W = 8      # narrow output width: lanes 0..2 = u,v,p ; lane 3 = evm ; rest 0


# ----------------------------------------------------------------------------- #
# Pallas kernel: fused (main + evm) MLP forward on one batch tile
# ----------------------------------------------------------------------------- #
def combined_kernel(x_ref, w1_ref, w_ref, b_ref, o_ref, *,
                    n_full_tanh, n_masked, main_width):
    """x_ref:  (TM, IN_PAD) bf16   input tile (lanes 0..1 real, rest zero).
    w1_ref: (IN_PAD, DIM) bf16  first-layer weights (rows 0..1 real).
    w_ref:  (L, DIM, DIM) bf16  stacked block-diagonally packed layers 2..L+1.
    b_ref:  (L+1, DIM)    f32   stacked biases (row 0 = first layer's bias).
    o_ref:  (TM, OUT_W)   f32   packed outputs: u, v, p, evm, 0, 0, 0, 0.

    Layer schedule (static, fully unrolled):
      layer 1              : (TM,16)x(16,128) bf16 MXU matmul, f32 acc, tanh
      next n_full_tanh     : 128x128 bf16 matmul, tanh on all lanes
      next n_masked        : 128x128 bf16 matmul, tanh only on main lanes
                             (<main_width); the evm lane is carried linearly
      last layer           : 128x128 bf16 matmul, linear (routes evm -> lane 3)
    Zero padding is preserved everywhere (tanh(0)=0, pad weights/biases are 0,
    and 0.0 / 1.0 are exact in bf16).
    """
    # --- layer 1 ------------------------------------------------------------ #
    h = jnp.dot(x_ref[...], w1_ref[...], preferred_element_type=jnp.float32)
    h = h + b_ref[0:1, :]
    h = jnp.tanh(h)                                   # (TM, DIM) f32

    # lane mask: lanes < main_width belong to the main net's tanh stack.
    lane = jax.lax.broadcasted_iota(jnp.int32, (1, DIM), 1)
    main_mask = lane < main_width

    idx = 0
    # --- shared tanh layers (both nets still in their hidden stacks) -------- #
    for _ in range(n_full_tanh):
        h = jnp.dot(h.astype(jnp.bfloat16), w_ref[idx],
                    preferred_element_type=jnp.float32)
        h = h + b_ref[idx + 1:idx + 2, :]
        h = jnp.tanh(h)
        idx += 1

    # --- main-only tanh layers; evm output lane carried linearly ------------ #
    for _ in range(n_masked):
        h = jnp.dot(h.astype(jnp.bfloat16), w_ref[idx],
                    preferred_element_type=jnp.float32)
        h = h + b_ref[idx + 1:idx + 2, :]
        h = jnp.where(main_mask, jnp.tanh(h), h)
        idx += 1

    # --- final linear layer (main output + evm routing) --------------------- #
    h = jnp.dot(h.astype(jnp.bfloat16), w_ref[idx],
                preferred_element_type=jnp.float32)
    h = h + b_ref[idx + 1:idx + 2, :]

    o_ref[...] = h[:, :o_ref.shape[-1]].astype(o_ref.dtype)


def _const_spec(shape, single_buffer):
    """BlockSpec for a grid-invariant operand (index_map always returns 0s)."""
    ndim = len(shape)
    index_map = lambda i, _nd=ndim: (0,) * _nd
    if single_buffer:
        # Weights never change block index -> the default second buffer is waste.
        return pl.BlockSpec(shape, index_map, pipeline_mode=pl.Buffered(1))
    return pl.BlockSpec(shape, index_map)


def run_combined(x, w1, w, b, meta, tm, single_buffer_weights=True):
    """x: (N_pad, IN_PAD) bf16, N_pad multiple of tm. Returns (N_pad, OUT_W) f32."""
    n = x.shape[0]
    n_layers = w.shape[0]
    kernel = functools.partial(
        combined_kernel,
        n_full_tanh=meta["n_full_tanh"],
        n_masked=meta["n_masked"],
        main_width=meta["main_width"],
    )
    return pl.pallas_call(
        kernel,
        out_shape=jax.ShapeDtypeStruct((n, OUT_W), jnp.float32),
        grid_spec=pltpu.PrefetchScalarGridSpec(
            num_scalar_prefetch=0,
            grid=(n // tm,),
            in_specs=[
                pl.BlockSpec((tm, IN_PAD), lambda i: (i, 0)),        # narrow input
                _const_spec((IN_PAD, DIM), single_buffer_weights),   # layer-1 W
                _const_spec((n_layers, DIM, DIM), single_buffer_weights),
                _const_spec((n_layers + 1, DIM), single_buffer_weights),
            ],
            out_specs=pl.BlockSpec((tm, OUT_W), lambda i: (i, 0)),   # narrow output
        ),
        compiler_params=pltpu.CompilerParams(
            dimension_semantics=("parallel",)),   # shards across v7x's two TCs
    )(x, w1, w, b)


# ----------------------------------------------------------------------------- #
# Parameter construction (deterministic, synthetic) — plain JAX glue
# ----------------------------------------------------------------------------- #
def _weight_norm(v, g):
    """PyTorch-style weight_norm over the input dim: W = g * V / ||V||_row."""
    norm = jnp.sqrt(jnp.sum(v * v, axis=1, keepdims=True)) + 1e-12
    return g * v / norm


def make_fully_connected_params(key, in_features, out_features, num_layers,
                                layer_size):
    """FullyConnected: `num_layers` hidden layers (weight-norm, tanh) + linear out.
    Returns per-layer lists: weights as (in, out) for x @ W, and biases (out,)."""
    dims = [in_features] + [layer_size] * num_layers + [out_features]
    n_lin = len(dims) - 1
    keys = jax.random.split(key, 3 * n_lin)

    ws, bs = [], []
    for l in range(n_lin):
        fan_in, fan_out = dims[l], dims[l + 1]
        kv, kg, kb = keys[3 * l], keys[3 * l + 1], keys[3 * l + 2]
        scale = 1.0 / jnp.sqrt(jnp.float32(fan_in))
        v = jax.random.normal(kv, (fan_out, fan_in), jnp.float32) * scale
        if l < n_lin - 1:
            g = 1.0 + 0.01 * jax.random.normal(kg, (fan_out, 1), jnp.float32)
            w = _weight_norm(v, g)                   # hidden layer: weight-norm
        else:
            w = v                                    # output layer: plain linear
        b = 0.01 * jax.random.normal(kb, (fan_out,), jnp.float32)
        ws.append(w.T)                               # (in, out)
        bs.append(b)
    return ws, bs


def pack_combined_params(main_ws, main_bs, evm_ws, evm_bs):
    """Block-diagonally pack main + evm MLPs into one padded 128-lane stack.

    Weights are returned in bf16 (native MXU dtype on v5e/v6e/v7x); biases stay
    f32.  All padded regions are exactly 0 and identity carries exactly 1, both
    exact in bf16, so the packing/routing is unaffected by the cast.
    """
    h_m = len(main_ws) - 1          # main hidden layer count (6)
    h_e = len(evm_ws) - 1           # evm hidden layer count  (4)
    assert h_e < h_m, "packing assumes evm is shallower than main (default cfg)"
    in_f = main_ws[0].shape[0]
    assert evm_ws[0].shape[0] == in_f and in_f <= IN_PAD
    mw = main_ws[0].shape[1]        # 80
    ew = evm_ws[0].shape[1]         # 40
    m_out = main_ws[-1].shape[1]    # 3
    e_out = evm_ws[-1].shape[1]     # 1
    evm_lane = mw + ew              # 120: lane that carries the evm output
    assert evm_lane + e_out <= DIM
    assert m_out + e_out <= OUT_W

    # layer 1: main -> lanes [0, mw), evm -> lanes [mw, mw+ew)
    w1 = jnp.zeros((IN_PAD, DIM), jnp.float32)
    w1 = w1.at[:in_f, :mw].set(main_ws[0])
    w1 = w1.at[:in_f, mw:mw + ew].set(evm_ws[0])

    n_layers = h_m                  # stacked 128x128 layers (layers 2 .. h_m+1)
    w = jnp.zeros((n_layers, DIM, DIM), jnp.float32)
    b = jnp.zeros((n_layers + 1, DIM), jnp.float32)
    b = b.at[0, :mw].set(main_bs[0]).at[0, mw:mw + ew].set(evm_bs[0])

    # shared tanh layers: combined layers 2 .. h_e
    for j in range(1, h_e):
        w = w.at[j - 1, :mw, :mw].set(main_ws[j])
        w = w.at[j - 1, mw:mw + ew, mw:mw + ew].set(evm_ws[j])
        b = b.at[j, :mw].set(main_bs[j]).at[j, mw:mw + ew].set(evm_bs[j])

    # combined layer h_e+1: main hidden (masked tanh) + evm OUTPUT (linear)
    j = h_e
    w = w.at[j - 1, :mw, :mw].set(main_ws[j])
    w = w.at[j - 1, mw:mw + ew, evm_lane:evm_lane + e_out].set(evm_ws[h_e])
    b = b.at[j, :mw].set(main_bs[j])
    b = b.at[j, evm_lane:evm_lane + e_out].set(evm_bs[h_e])

    # remaining main hidden layers: carry the evm result via identity columns
    for j in range(h_e + 1, h_m):
        w = w.at[j - 1, :mw, :mw].set(main_ws[j])
        for t in range(e_out):
            w = w.at[j - 1, evm_lane + t, evm_lane + t].set(1.0)
        b = b.at[j, :mw].set(main_bs[j])

    # final linear layer: main out -> lanes [0, m_out); evm routed to [m_out, ...)
    w = w.at[h_m - 1, :mw, :m_out].set(main_ws[h_m])
    for t in range(e_out):
        w = w.at[h_m - 1, evm_lane + t, m_out + t].set(1.0)
    b = b.at[h_m, :m_out].set(main_bs[h_m])

    meta = dict(n_full_tanh=h_e - 1, n_masked=h_m - h_e, main_width=mw)
    # bf16 matmul operands (f32 accumulation happens in the kernel's dots).
    return w1.astype(jnp.bfloat16), w.astype(jnp.bfloat16), b, meta


# ----------------------------------------------------------------------------- #
# CombinedPhysicsNeMoNet forward
# ----------------------------------------------------------------------------- #
def _round_up(n, m):
    return ((n + m - 1) // m) * m


def _choose_tm(n):
    """Large batch tiles amortize the ~0.35 us/grid-step overhead and keep the
    MXU M-stream long per weight push.  Require >= 4 tiles of work so padding
    to an even grid (for v7x's two TensorCores) stays bounded.  VMEM is never
    the constraint here (< ~3 MiB total even at TM=2048, incl. on v7x)."""
    for tm in (2048, 1024, 512, 256):
        if n >= 4 * tm:
            return tm
    return 128


def combined_forward(input_dict, packed, input_keys, main_keys, evm_keys):
    """input_dict: {'x': (N,1), 'y': (N,1)} -> {'u','v','p','evm'} each (N,1)."""
    w1, w, b, meta = packed
    x = jnp.concatenate([input_dict[k] for k in input_keys], axis=-1)
    x = x.astype(jnp.float32)
    n, f_in = x.shape
    tm = _choose_tm(n)
    n_pad = _round_up(n, 2 * tm)          # even grid -> both v7x TCs stay busy
    x_pad = jnp.zeros((n_pad, IN_PAD), jnp.bfloat16)
    x_pad = x_pad.at[:n, :f_in].set(x.astype(jnp.bfloat16))

    try:
        out = run_combined(x_pad, w1, w, b, meta, tm, single_buffer_weights=True)
    except Exception:
        # Fallback for jax versions without BlockSpec(pipeline_mode=...):
        # identical results, weights just get the default double buffer.
        out = run_combined(x_pad, w1, w, b, meta, tm, single_buffer_weights=False)
    out = out[:n]                          # (N, OUT_W)

    result = {}
    nm = len(main_keys)
    for i, k in enumerate(main_keys):
        result[k] = out[:, i:i + 1]
    for i, k in enumerate(evm_keys):
        result[k] = out[:, nm + i:nm + i + 1]
    return result


# ----------------------------------------------------------------------------- #
# Pure-JAX references for correctness checks
# ----------------------------------------------------------------------------- #
def reference_mlp(x, ws, bs):
    """Unpacked full-f32 reference (PyTorch-equivalent math)."""
    h = x
    for l in range(len(ws)):
        h = h @ ws[l] + bs[l]
        if l < len(ws) - 1:
            h = jnp.tanh(h)
    return h


def packed_reference(x, packed):
    """Pure-JAX mirror of the kernel math: same packing, same bf16 operand
    casts, f32 accumulation/bias/tanh.  Should match the kernel very tightly."""
    w1, w, b, meta = packed
    f_in = x.shape[-1]
    h = jnp.dot(x.astype(jnp.bfloat16), w1[:f_in, :],
                preferred_element_type=jnp.float32) + b[0]
    h = jnp.tanh(h)
    main_mask = jnp.arange(DIM) < meta["main_width"]
    idx = 0
    for _ in range(meta["n_full_tanh"]):
        h = jnp.dot(h.astype(jnp.bfloat16), w[idx],
                    preferred_element_type=jnp.float32) + b[idx + 1]
        h = jnp.tanh(h)
        idx += 1
    for _ in range(meta["n_masked"]):
        h = jnp.dot(h.astype(jnp.bfloat16), w[idx],
                    preferred_element_type=jnp.float32) + b[idx + 1]
        h = jnp.where(main_mask, jnp.tanh(h), h)
        idx += 1
    h = jnp.dot(h.astype(jnp.bfloat16), w[idx],
                preferred_element_type=jnp.float32) + b[idx + 1]
    return h[:, :OUT_W]


if __name__ == "__main__":
    key = jax.random.PRNGKey(0)
    k_main, k_evm, k_x, k_y = jax.random.split(key, 4)

    # main_net_config: in=2 ('x','y'), out=3 ('u','v','p'), 6 layers x 80, tanh
    main_ws, main_bs = make_fully_connected_params(k_main, 2, 3, 6, 80)
    # evm_net_config: in=2, out=1 ('evm'), 4 layers x 40, tanh
    evm_ws, evm_bs = make_fully_connected_params(k_evm, 2, 1, 4, 40)
    packed = pack_combined_params(main_ws, main_bs, evm_ws, evm_bs)

    # Small example inputs: 256 collocation points with (x, y) coordinates.
    N = 256
    input_dict = {
        "x": jax.random.uniform(k_x, (N, 1), jnp.float32),
        "y": jax.random.uniform(k_y, (N, 1), jnp.float32),
    }

    out = combined_forward(input_dict, packed,
                           input_keys=["x", "y"],
                           main_keys=["u", "v", "p"],
                           evm_keys=["evm"])
    out = jax.tree_util.tree_map(jax.block_until_ready, out)

    x_cat = jnp.concatenate([input_dict["x"], input_dict["y"]], axis=-1)

    # (1) exact-math mirror of the kernel (same packing, same bf16 casts)
    mirror = packed_reference(x_cat, packed)
    mref = {"u": mirror[:, 0:1], "v": mirror[:, 1:2],
            "p": mirror[:, 2:3], "evm": mirror[:, 3:4]}
    # (2) unpacked full-f32 reference (original module semantics); tolerance is
    #     loosened because matmul operands are bf16 (f32 accumulate) per review.
    ref_main = reference_mlp(x_cat, main_ws, main_bs)
    ref_evm = reference_mlp(x_cat, evm_ws, evm_bs)
    fref = {"u": ref_main[:, 0:1], "v": ref_main[:, 1:2],
            "p": ref_main[:, 2:3], "evm": ref_evm[:, 0:1]}

    for k in ["u", "v", "p", "evm"]:
        assert out[k].shape == (N, 1), (k, out[k].shape)
        assert jnp.allclose(out[k], mref[k], atol=1e-3, rtol=1e-3), k
        assert jnp.allclose(out[k], fref[k], atol=1e-1, rtol=1e-1), k

    print("KERNEL_OK")
</pallas_src>

<mosaic_0001>
module attributes {stable_mosaic.version = 11 : i64} {
  func.func @combined_kernel(%arg0: i32, %arg1: memref<128x16xbf16, #tpu.memory_space<vmem>>, %arg2: memref<16x128xbf16, #tpu.memory_space<vmem>>, %arg3: memref<6x128x128xbf16, #tpu.memory_space<vmem>>, %arg4: memref<7x128xf32, #tpu.memory_space<vmem>>, %arg5: memref<128x8xf32, #tpu.memory_space<vmem>>) attributes {dimension_semantics = [#tpu.dimension_semantics<parallel>], iteration_bounds = array<i64: 2>, scalar_prefetch = 0 : i64, scratch_operands = 0 : i64, tpu.core_type = #tpu.core_type<tc>, window_params = [{transform_indices = @transform_0, window_bounds = array<i64: 128, 16>}, {pipeline_mode = #tpu.pipeline_mode<synchronous>, transform_indices = @transform_1, window_bounds = array<i64: 16, 128>}, {pipeline_mode = #tpu.pipeline_mode<synchronous>, transform_indices = @transform_2, window_bounds = array<i64: 6, 128, 128>}, {pipeline_mode = #tpu.pipeline_mode<synchronous>, transform_indices = @transform_3, window_bounds = array<i64: 7, 128>}, {transform_indices = @transform_4, window_bounds = array<i64: 128, 8>}]} {
    %c0 = arith.constant 0 : index
    %c0_0 = arith.constant 0 : index
    %0 = vector.load %arg1[%c0, %c0_0] : memref<128x16xbf16, #tpu.memory_space<vmem>>, vector<128x16xbf16>
    %c0_1 = arith.constant 0 : index
    %c0_2 = arith.constant 0 : index
    %1 = vector.load %arg2[%c0_1, %c0_2] : memref<16x128xbf16, #tpu.memory_space<vmem>>, vector<16x128xbf16>
    %cst = arith.constant dense<0.000000e+00> : vector<128x128xf32>
    %2 = tpu.matmul %0, %1, %cst {dimension_numbers = #tpu.dot_dimension_numbers<[1], [0], [0], [1], [0, 0, 1, 1], [], []>} : vector<128x16xbf16>, vector<16x128xbf16>, vector<128x128xf32> -> vector<128x128xf32>
    %c0_3 = arith.constant 0 : index
    %c0_4 = arith.constant 0 : index
    %3 = vector.load %arg4[%c0_3, %c0_4] : memref<7x128xf32, #tpu.memory_space<vmem>>, vector<1x128xf32>
    %4 = vector.broadcast %3 : vector<1x128xf32> to vector<128x128xf32>
    %5 = arith.addf %2, %4 : vector<128x128xf32>
    %6 = math.tanh %5 : vector<128x128xf32>
    %7 = tpu.iota {dimensions = array<i32: 1>} : vector<1x128xi32>
    %c80_i32 = arith.constant 80 : i32
    %8 = vector.broadcast %c80_i32 : i32 to vector<1x128xi32>
    %9 = arith.cmpi slt, %7, %8 : vector<1x128xi32>
    %10 = arith.truncf %6 : vector<128x128xf32> to vector<128x128xbf16>
    %c0_5 = arith.constant 0 : index
    %c0_6 = arith.constant 0 : index
    %c0_7 = arith.constant 0 : index
    %11 = vector.load %arg3[%c0_5, %c0_6, %c0_7] : memref<6x128x128xbf16, #tpu.memory_space<vmem>>, vector<1x128x128xbf16>
    %12 = vector.shape_cast %11 : vector<1x128x128xbf16> to vector<128x128xbf16>
    %cst_8 = arith.constant dense<0.000000e+00> : vector<128x128xf32>
    %13 = tpu.matmul %10, %12, %cst_8 {dimension_numbers = #tpu.dot_dimension_numbers<[1], [0], [0], [1], [0, 0, 1, 1], [], []>} : vector<128x128xbf16>, vector<128x128xbf16>, vector<128x128xf32> -> vector<128x128xf32>
    %c1 = arith.constant 1 : index
    %c0_9 = arith.constant 0 : index
    %14 = vector.load %arg4[%c1, %c0_9] : memref<7x128xf32, #tpu.memory_space<vmem>>, vector<1x128xf32>
    %15 = vector.broadcast %14 : vector<1x128xf32> to vector<128x128xf32>
    %16 = arith.addf %13, %15 : vector<128x128xf32>
    %17 = math.tanh %16 : vector<128x128xf32>
    %18 = arith.truncf %17 : vector<128x128xf32> to vector<128x128xbf16>
    %c1_10 = arith.constant 1 : index
    %c0_11 = arith.constant 0 : index
    %c0_12 = arith.constant 0 : index
    %19 = vector.load %arg3[%c1_10, %c0_11, %c0_12] : memref<6x128x128xbf16, #tpu.memory_space<vmem>>, vector<1x128x128xbf16>
    %20 = vector.shape_cast %19 : vector<1x128x128xbf16> to vector<128x128xbf16>
    %cst_13 = arith.constant dense<0.000000e+00> : vector<128x128xf32>
    %21 = tpu.matmul %18, %20, %cst_13 {dimension_numbers = #tpu.dot_dimension_numbers<[1], [0], [0], [1], [0, 0, 1, 1], [], []>} : vector<128x128xbf16>, vector<128x128xbf16>, vector<128x128xf32> -> vector<128x128xf32>
    %c2 = arith.constant 2 : index
    %c0_14 = arith.constant 0 : index
    %22 = vector.load %arg4[%c2, %c0_14] : memref<7x128xf32, #tpu.memory_space<vmem>>, vector<1x128xf32>
    %23 = vector.broadcast %22 : vector<1x128xf32> to vector<128x128xf32>
    %24 = arith.addf %21, %23 : vector<128x128xf32>
    %25 = math.tanh %24 : vector<128x128xf32>
    %26 = arith.truncf %25 : vector<128x128xf32> to vector<128x128xbf16>
    %c2_15 = arith.constant 2 : index
    %c0_16 = arith.constant 0 : index
    %c0_17 = arith.constant 0 : index
    %27 = vector.load %arg3[%c2_15, %c0_16, %c0_17] : memref<6x128x128xbf16, #tpu.memory_space<vmem>>, vector<1x128x128xbf16>
    %28 = vector.shape_cast %27 : vector<1x128x128xbf16> to vector<128x128xbf16>
    %cst_18 = arith.constant dense<0.000000e+00> : vector<128x128xf32>
    %29 = tpu.matmul %26, %28, %cst_18 {dimension_numbers = #tpu.dot_dimension_numbers<[1], [0], [0], [1], [0, 0, 1, 1], [], []>} : vector<128x128xbf16>, vector<128x128xbf16>, vector<128x128xf32> -> vector<128x128xf32>
    %c3 = arith.constant 3 : index
    %c0_19 = arith.constant 0 : index
    %30 = vector.load %arg4[%c3, %c0_19] : memref<7x128xf32, #tpu.memory_space<vmem>>, vector<1x128xf32>
    %31 = vector.broadcast %30 : vector<1x128xf32> to vector<128x128xf32>
    %32 = arith.addf %29, %31 : vector<128x128xf32>
    %33 = math.tanh %32 : vector<128x128xf32>
    %34 = arith.truncf %33 : vector<128x128xf32> to vector<128x128xbf16>
    %c3_20 = arith.constant 3 : index
    %c0_21 = arith.constant 0 : index
    %c0_22 = arith.constant 0 : index
    %35 = vector.load %arg3[%c3_20, %c0_21, %c0_22] : memref<6x128x128xbf16, #tpu.memory_space<vmem>>, vector<1x128x128xbf16>
    %36 = vector.shape_cast %35 : vector<1x128x128xbf16> to vector<128x128xbf16>
    %cst_23 = arith.constant dense<0.000000e+00> : vector<128x128xf32>
    %37 = tpu.matmul %34, %36, %cst_23 {dimension_numbers = #tpu.dot_dimension_numbers<[1], [0], [0], [1], [0, 0, 1, 1], [], []>} : vector<128x128xbf16>, vector<128x128xbf16>, vector<128x128xf32> -> vector<128x128xf32>
    %c4 = arith.constant 4 : index
    %c0_24 = arith.constant 0 : index
    %38 = vector.load %arg4[%c4, %c0_24] : memref<7x128xf32, #tpu.memory_space<vmem>>, vector<1x128xf32>
    %39 = vector.broadcast %38 : vector<1x128xf32> to vector<128x128xf32>
    %40 = arith.addf %37, %39 : vector<128x128xf32>
    %41 = math.tanh %40 : vector<128x128xf32>
    %42 = vector.shape_cast %9 : vector<1x128xi1> to vector<1x128xi1>
    %43 = vector.broadcast %42 : vector<1x128xi1> to vector<128x128xi1>
    %44 = arith.select %43, %41, %40 : vector<128x128xi1>, vector<128x128xf32>
    %45 = arith.truncf %44 : vector<128x128xf32> to vector<128x128xbf16>
    %c4_25 = arith.constant 4 : index
    %c0_26 = arith.constant 0 : index
    %c0_27 = arith.constant 0 : index
    %46 = vector.load %arg3[%c4_25, %c0_26, %c0_27] : memref<6x128x128xbf16, #tpu.memory_space<vmem>>, vector<1x128x128xbf16>
    %47 = vector.shape_cast %46 : vector<1x128x128xbf16> to vector<128x128xbf16>
    %cst_28 = arith.constant dense<0.000000e+00> : vector<128x128xf32>
    %48 = tpu.matmul %45, %47, %cst_28 {dimension_numbers = #tpu.dot_dimension_numbers<[1], [0], [0], [1], [0, 0, 1, 1], [], []>} : vector<128x128xbf16>, vector<128x128xbf16>, vector<128x128xf32> -> vector<128x128xf32>
    %c5 = arith.constant 5 : index
    %c0_29 = arith.constant 0 : index
    %49 = vector.load %arg4[%c5, %c0_29] : memref<7x128xf32, #tpu.memory_space<vmem>>, vector<1x128xf32>
    %50 = vector.broadcast %49 : vector<1x128xf32> to vector<128x128xf32>
    %51 = arith.addf %48, %50 : vector<128x128xf32>
    %52 = math.tanh %51 : vector<128x128xf32>
    %53 = vector.shape_cast %9 : vector<1x128xi1> to vector<1x128xi1>
    %54 = vector.broadcast %53 : vector<1x128xi1> to vector<128x128xi1>
    %55 = arith.select %54, %52, %51 : vector<128x128xi1>, vector<128x128xf32>
    %56 = arith.truncf %55 : vector<128x128xf32> to vector<128x128xbf16>
    %c5_30 = arith.constant 5 : index
    %c0_31 = arith.constant 0 : index
    %c0_32 = arith.constant 0 : index
    %57 = vector.load %arg3[%c5_30, %c0_31, %c0_32] : memref<6x128x128xbf16, #tpu.memory_space<vmem>>, vector<1x128x128xbf16>
    %58 = vector.shape_cast %57 : vector<1x128x128xbf16> to vector<128x128xbf16>
    %cst_33 = arith.constant dense<0.000000e+00> : vector<128x128xf32>
    %59 = tpu.matmul %56, %58, %cst_33 {dimension_numbers = #tpu.dot_dimension_numbers<[1], [0], [0], [1], [0, 0, 1, 1], [], []>} : vector<128x128xbf16>, vector<128x128xbf16>, vector<128x128xf32> -> vector<128x128xf32>
    %c6 = arith.constant 6 : index
    %c0_34 = arith.constant 0 : index
    %60 = vector.load %arg4[%c6, %c0_34] : memref<7x128xf32, #tpu.memory_space<vmem>>, vector<1x128xf32>
    %61 = vector.broadcast %60 : vector<1x128xf32> to vector<128x128xf32>
    %62 = arith.addf %59, %61 : vector<128x128xf32>
    %63 = vector.extract_strided_slice %62 {offsets = [0, 0], sizes = [128, 8], strides = [1, 1]} : vector<128x128xf32> to vector<128x8xf32>
    %c0_35 = arith.constant 0 : index
    %c0_36 = arith.constant 0 : index
    %64 = vector.load %arg5[%c0_35, %c0_36] : memref<128x8xf32, #tpu.memory_space<vmem>>, vector<128x8xf32>
    tpu.vector_store %arg5[%c0_35, %c0_36], %63 {strides = array<i32>} : memref<128x8xf32, #tpu.memory_space<vmem>>, vector<128x8xf32>,
    return
  }
  func.func @transform_0(%arg0: i32) -> (i32, i32) {
    %c0_i32 = arith.constant 0 : i32
    %c0_i32_0 = arith.constant 0 : i32
    return %arg0, %c0_i32 : i32, i32
  }
  func.func @transform_1(%arg0: i32) -> (i32, i32) {
    %c0_i32 = arith.constant 0 : i32
    %c0_i32_0 = arith.constant 0 : i32
    %c0_i32_1 = arith.constant 0 : i32
    return %c0_i32, %c0_i32_0 : i32, i32
  }
  func.func @transform_2(%arg0: i32) -> (i32, i32, i32) {
    %c0_i32 = arith.constant 0 : i32
    %c0_i32_0 = arith.constant 0 : i32
    %c0_i32_1 = arith.constant 0 : i32
    %c0_i32_2 = arith.constant 0 : i32
    return %c0_i32, %c0_i32_0, %c0_i32_1 : i32, i32, i32
  }
  func.func @transform_3(%arg0: i32) -> (i32, i32) {
    %c0_i32 = arith.constant 0 : i32
    %c0_i32_0 = arith.constant 0 : i32
    %c0_i32_1 = arith.constant 0 : i32
    return %c0_i32, %c0_i32_0 : i32, i32
  }
  func.func @transform_4(%arg0: i32) -> (i32, i32) {
    %c0_i32 = arith.constant 0 : i32
    %c0_i32_0 = arith.constant 0 : i32
    return %arg0, %c0_i32 : i32, i32
  }
}

module attributes {stable_mosaic.version = 11 : i64} {
  func.func @combined_kernel(%arg0: i32, %arg1: memref<128x16xbf16, #tpu.memory_space<vmem>>, %arg2: memref<16x128xbf16, #tpu.memory_space<vmem>>, %arg3: memref<6x128x128xbf16, #tpu.memory_space<vmem>>, %arg4: memref<7x128xf32, #tpu.memory_space<vmem>>, %arg5: memref<128x8xf32, #tpu.memory_space<vmem>>) attributes {dimension_semantics = [#tpu.dimension_semantics<parallel>], iteration_bounds = array<i64: 2>, scalar_prefetch = 0 : i64, scratch_operands = 0 : i64, tpu.core_type = #tpu.core_type<tc>, window_params = [{transform_indices = @transform_0, window_bounds = array<i64: 128, 16>}, {pipeline_mode = #tpu.pipeline_mode<synchronous>, transform_indices = @transform_1, window_bounds = array<i64: 16, 128>}, {pipeline_mode = #tpu.pipeline_mode<synchronous>, transform_indices = @transform_2, window_bounds = array<i64: 6, 128, 128>}, {pipeline_mode = #tpu.pipeline_mode<synchronous>, transform_indices = @transform_3, window_bounds = array<i64: 7, 128>}, {transform_indices = @transform_4, window_bounds = array<i64: 128, 8>}]} {
    %c0 = arith.constant 0 : index
    %c0_0 = arith.constant 0 : index
    %0 = vector.load %arg1[%c0, %c0_0] : memref<128x16xbf16, #tpu.memory_space<vmem>>, vector<128x16xbf16>
    %c0_1 = arith.constant 0 : index
    %c0_2 = arith.constant 0 : index
    %1 = vector.load %arg2[%c0_1, %c0_2] : memref<16x128xbf16, #tpu.memory_space<vmem>>, vector<16x128xbf16>
    %cst = arith.constant dense<0.000000e+00> : vector<128x128xf32>
    %2 = tpu.matmul %0, %1, %cst {dimension_numbers = #tpu.dot_dimension_numbers<[1], [0], [0], [1], [0, 0, 1, 1], [], []>} : vector<128x16xbf16>, vector<16x128xbf16>, vector<128x128xf32> -> vector<128x128xf32>
    %c0_3 = arith.constant 0 : index
    %c0_4 = arith.constant 0 : index
    %3 = vector.load %arg4[%c0_3, %c0_4] : memref<7x128xf32, #tpu.memory_space<vmem>>, vector<1x128xf32>
    %4 = vector.broadcast %3 : vector<1x128xf32> to vector<128x128xf32>
    %5 = arith.addf %2, %4 : vector<128x128xf32>
    %6 = math.tanh %5 : vector<128x128xf32>
    %7 = tpu.iota {dimensions = array<i32: 1>} : vector<1x128xi32>
    %c80_i32 = arith.constant 80 : i32
    %8 = vector.broadcast %c80_i32 : i32 to vector<1x128xi32>
    %9 = arith.cmpi slt, %7, %8 : vector<1x128xi32>
    %10 = arith.truncf %6 : vector<128x128xf32> to vector<128x128xbf16>
    %c0_5 = arith.constant 0 : index
    %c0_6 = arith.constant 0 : index
    %c0_7 = arith.constant 0 : index
    %11 = vector.load %arg3[%c0_5, %c0_6, %c0_7] : memref<6x128x128xbf16, #tpu.memory_space<vmem>>, vector<1x128x128xbf16>
    %12 = vector.shape_cast %11 : vector<1x128x128xbf16> to vector<128x128xbf16>
    %cst_8 = arith.constant dense<0.000000e+00> : vector<128x128xf32>
    %13 = tpu.matmul %10, %12, %cst_8 {dimension_numbers = #tpu.dot_dimension_numbers<[1], [0], [0], [1], [0, 0, 1, 1], [], []>} : vector<128x128xbf16>, vector<128x128xbf16>, vector<128x128xf32> -> vector<128x128xf32>
    %c1 = arith.constant 1 : index
    %c0_9 = arith.constant 0 : index
    %14 = vector.load %arg4[%c1, %c0_9] : memref<7x128xf32, #tpu.memory_space<vmem>>, vector<1x128xf32>
    %15 = vector.broadcast %14 : vector<1x128xf32> to vector<128x128xf32>
    %16 = arith.addf %13, %15 : vector<128x128xf32>
    %17 = math.tanh %16 : vector<128x128xf32>
    %18 = arith.truncf %17 : vector<128x128xf32> to vector<128x128xbf16>
    %c1_10 = arith.constant 1 : index
    %c0_11 = arith.constant 0 : index
    %c0_12 = arith.constant 0 : index
    %19 = vector.load %arg3[%c1_10, %c0_11, %c0_12] : memref<6x128x128xbf16, #tpu.memory_space<vmem>>, vector<1x128x128xbf16>
    %20 = vector.shape_cast %19 : vector<1x128x128xbf16> to vector<128x128xbf16>
    %cst_13 = arith.constant dense<0.000000e+00> : vector<128x128xf32>
    %21 = tpu.matmul %18, %20, %cst_13 {dimension_numbers = #tpu.dot_dimension_numbers<[1], [0], [0], [1], [0, 0, 1, 1], [], []>} : vector<128x128xbf16>, vector<128x128xbf16>, vector<128x128xf32> -> vector<128x128xf32>
    %c2 = arith.constant 2 : index
    %c0_14 = arith.constant 0 : index
    %22 = vector.load %arg4[%c2, %c0_14] : memref<7x128xf32, #tpu.memory_space<vmem>>, vector<1x128xf32>
    %23 = vector.broadcast %22 : vector<1x128xf32> to vector<128x128xf32>
    %24 = arith.addf %21, %23 : vector<128x128xf32>
    %25 = math.tanh %24 : vector<128x128xf32>
    %26 = arith.truncf %25 : vector<128x128xf32> to vector<128x128xbf16>
    %c2_15 = arith.constant 2 : index
    %c0_16 = arith.constant 0 : index
    %c0_17 = arith.constant 0 : index
    %27 = vector.load %arg3[%c2_15, %c0_16, %c0_17] : memref<6x128x128xbf16, #tpu.memory_space<vmem>>, vector<1x128x128xbf16>
    %28 = vector.shape_cast %27 : vector<1x128x128xbf16> to vector<128x128xbf16>
    %cst_18 = arith.constant dense<0.000000e+00> : vector<128x128xf32>
    %29 = tpu.matmul %26, %28, %cst_18 {dimension_numbers = #tpu.dot_dimension_numbers<[1], [0], [0], [1], [0, 0, 1, 1], [], []>} : vector<128x128xbf16>, vector<128x128xbf16>, vector<128x128xf32> -> vector<128x128xf32>
    %c3 = arith.constant 3 : index
    %c0_19 = arith.constant 0 : index
    %30 = vector.load %arg4[%c3, %c0_19] : memref<7x128xf32, #tpu.memory_space<vmem>>, vector<1x128xf32>
    %31 = vector.broadcast %30 : vector<1x128xf32> to vector<128x128xf32>
    %32 = arith.addf %29, %31 : vector<128x128xf32>
    %33 = math.tanh %32 : vector<128x128xf32>
    %34 = arith.truncf %33 : vector<128x128xf32> to vector<128x128xbf16>
    %c3_20 = arith.constant 3 : index
    %c0_21 = arith.constant 0 : index
    %c0_22 = arith.constant 0 : index
    %35 = vector.load %arg3[%c3_20, %c0_21, %c0_22] : memref<6x128x128xbf16, #tpu.memory_space<vmem>>, vector<1x128x128xbf16>
    %36 = vector.shape_cast %35 : vector<1x128x128xbf16> to vector<128x128xbf16>
    %cst_23 = arith.constant dense<0.000000e+00> : vector<128x128xf32>
    %37 = tpu.matmul %34, %36, %cst_23 {dimension_numbers = #tpu.dot_dimension_numbers<[1], [0], [0], [1], [0, 0, 1, 1], [], []>} : vector<128x128xbf16>, vector<128x128xbf16>, vector<128x128xf32> -> vector<128x128xf32>
    %c4 = arith.constant 4 : index
    %c0_24 = arith.constant 0 : index
    %38 = vector.load %arg4[%c4, %c0_24] : memref<7x128xf32, #tpu.memory_space<vmem>>, vector<1x128xf32>
    %39 = vector.broadcast %38 : vector<1x128xf32> to vector<128x128xf32>
    %40 = arith.addf %37, %39 : vector<128x128xf32>
    %41 = math.tanh %40 : vector<128x128xf32>
    %42 = vector.shape_cast %9 : vector<1x128xi1> to vector<1x128xi1>
    %43 = vector.broadcast %42 : vector<1x128xi1> to vector<128x128xi1>
    %44 = arith.select %43, %41, %40 : vector<128x128xi1>, vector<128x128xf32>
    %45 = arith.truncf %44 : vector<128x128xf32> to vector<128x128xbf16>
    %c4_25 = arith.constant 4 : index
    %c0_26 = arith.constant 0 : index
    %c0_27 = arith.constant 0 : index
    %46 = vector.load %arg3[%c4_25, %c0_26, %c0_27] : memref<6x128x128xbf16, #tpu.memory_space<vmem>>, vector<1x128x128xbf16>
    %47 = vector.shape_cast %46 : vector<1x128x128xbf16> to vector<128x128xbf16>
    %cst_28 = arith.constant dense<0.000000e+00> : vector<128x128xf32>
    %48 = tpu.matmul %45, %47, %cst_28 {dimension_numbers = #tpu.dot_dimension_numbers<[1], [0], [0], [1], [0, 0, 1, 1], [], []>} : vector<128x128xbf16>, vector<128x128xbf16>, vector<128x128xf32> -> vector<128x128xf32>
    %c5 = arith.constant 5 : index
    %c0_29 = arith.constant 0 : index
    %49 = vector.load %arg4[%c5, %c0_29] : memref<7x128xf32, #tpu.memory_space<vmem>>, vector<1x128xf32>
    %50 = vector.broadcast %49 : vector<1x128xf32> to vector<128x128xf32>
    %51 = arith.addf %48, %50 : vector<128x128xf32>
    %52 = math.tanh %51 : vector<128x128xf32>
    %53 = vector.shape_cast %9 : vector<1x128xi1> to vector<1x128xi1>
    %54 = vector.broadcast %53 : vector<1x128xi1> to vector<128x128xi1>
    %55 = arith.select %54, %52, %51 : vector<128x128xi1>, vector<128x128xf32>
    %56 = arith.truncf %55 : vector<128x128xf32> to vector<128x128xbf16>
    %c5_30 = arith.constant 5 : index
    %c0_31 = arith.constant 0 : index
    %c0_32 = arith.constant 0 : index
    %57 = vector.load %arg3[%c5_30, %c0_31, %c0_32] : memref<6x128x128xbf16, #tpu.memory_space<vmem>>, vector<1x128x128xbf16>
    %58 = vector.shape_cast %57 : vector<1x128x128xbf16> to vector<128x128xbf16>
    %cst_33 = arith.constant dense<0.000000e+00> : vector<128x128xf32>
    %59 = tpu.matmul %56, %58, %cst_33 {dimension_numbers = #tpu.dot_dimension_numbers<[1], [0], [0], [1], [0, 0, 1, 1], [], []>} : vector<128x128xbf16>, vector<128x128xbf16>, vector<128x128xf32> -> vector<128x128xf32>
    %c6 = arith.constant 6 : index
    %c0_34 = arith.constant 0 : index
    %60 = vector.load %arg4[%c6, %c0_34] : memref<7x128xf32, #tpu.memory_space<vmem>>, vector<1x128xf32>
    %61 = vector.broadcast %60 : vector<1x128xf32> to vector<128x128xf32>
    %62 = arith.addf %59, %61 : vector<128x128xf32>
    %63 = vector.extract_strided_slice %62 {offsets = [0, 0], sizes = [128, 8], strides = [1, 1]} : vector<128x128xf32> to vector<128x8xf32>
    %c0_35 = arith.constant 0 : index
    %c0_36 = arith.constant 0 : index
    %64 = vector.load %arg5[%c0_35, %c0_36] : memref<128x8xf32, #tpu.memory_space<vmem>>, vector<128x8xf32>
    tpu.vector_store %arg5[%c0_35, %c0_36], %63 {strides = array<i32>} : memref<128x8xf32, #tpu.memory_space<vmem>>, vector<128x8xf32>,
    return
  }
  func.func @transform_0(%arg0: i32) -> (i32, i32) {
    %c0_i32 = arith.constant 0 : i32
    %c0_i32_0 = arith.constant 0 : i32
    return %arg0, %c0_i32 : i32, i32
  }
  func.func @transform_1(%arg0: i32) -> (i32, i32) {
    %c0_i32 = arith.constant 0 : i32
    %c0_i32_0 = arith.constant 0 : i32
    %c0_i32_1 = arith.constant 0 : i32
    return %c0_i32, %c0_i32_0 : i32, i32
  }
  func.func @transform_2(%arg0: i32) -> (i32, i32, i32) {
    %c0_i32 = arith.constant 0 : i32
    %c0_i32_0 = arith.constant 0 : i32
    %c0_i32_1 = arith.constant 0 : i32
    %c0_i32_2 = arith.constant 0 : i32
    return %c0_i32, %c0_i32_0, %c0_i32_1 : i32, i32, i32
  }
  func.func @transform_3(%arg0: i32) -> (i32, i32) {
    %c0_i32 = arith.constant 0 : i32
    %c0_i32_0 = arith.constant 0 : i32
    %c0_i32_1 = arith.constant 0 : i32
    return %c0_i32, %c0_i32_0 : i32, i32
  }
  func.func @transform_4(%arg0: i32) -> (i32, i32) {
    %c0_i32 = arith.constant 0 : i32
    %c0_i32_0 = arith.constant 0 : i32
    return %arg0, %c0_i32 : i32, i32
  }
}

</mosaic_0001>

<bundles_post_ra>
// kernel: tpu_custom_call.1
= control target key start
LH: loop header
LB: loop body
LE: loop exit
PB: predicated region body
PF: predicated region fallthrough
CT: control target
= control target key end

     0   :  { %9 = vsyncpa [#allocation3], 0  ;;  %s1932_s15 = smov 0   ;;  %s2207_s0 = inlined_call_operand.vmem [shape: bf16[256,16], index: 0, kind: input, shape index: {}]   ;;  %s2208_s1 = inlined_call_operand.vmem [shape: bf16[16,128], index: 1, kind: input, shape index: {}]   ;;  %s2209_s2 = inlined_call_operand.hbm [shape: bf16[6,128,128], index: 2, kind: input, shape index: {}]   ;;  %s2210_s3 = inlined_call_operand.vmem [shape: f32[7,128], index: 3, kind: input, shape index: {}]   ;;  %s2211_s4 = inlined_call_operand.vmem [shape: f32[256,8], index: 4, kind: output, shape index: {}]  }
   0x1 LB: > { %s149_s18 = sshll.u32 %s2209_s2, 4  ;;  %s1320_s19 = sadd.s32 4294967295, %s1902_s15   ;;  %s1902_s15 = sphi %s1932_s15, %s15_s15   ;;  %s150_s18 = int_to_ptr.hbm [resolvable:$true] %s149_s18 }
   0x2   : > { %p1322_p0 = scmp.ge.s32.totalorder %s1902_s15, 1  ;;  %p135_p1 = scmp.lt.s32.totalorder %s1902_s15, 3 }
   0x3   : > { %p1650_p2 = scmp.eq.s32.totalorder %s1320_s19, 0  ;;  %s1904_s20 = smov [#allocation2]  }
   0x4   : > { %p136_p3 = pnand %p1322_p0, %p135_p1  ;;  %s151_s21 = sshll.u32 %s1904_s20, 4  ;;  %s152_s21 = int_to_ptr.vmem [resolvable:$true] %s151_s21 }
   0x5   : > { %s1905_s22 = smov 64   ;;  %s1906_s23 = smov 4  }
   0x6   : > { %p1646_p4 = pneg %p136_p3  ;;  %179 = sbr.rel (%p136_p3) target bundleno = 1164 (0x48c), region = 36 }
   0x8   : > { %p1647_p5 = pnand %p1650_p2, %p1646_p4 }
   0xa   : > { %1649 = dma.hbm_to_vmem [thread:$0]  (!%p1647_p5), %s150_s18, 6144, %s152_s21, [#allocation3], %s1905_s22, %s1905_s22, %s1906_s23  }
   0xb   : > { %1897 = dma.done.wait (%p1650_p2), [#allocation3], 6144  }
   0xc   : > { %1899 = vsyncadd (%p1650_p2), [#allocation3], 4294961152  ;;  %s1327_s24 = sshll.u32 %s1320_s19, 4  ;;  %v1577_v0 = vld [vmem:[%s2208_s1] sm:$0xff]  ;;  %vm285_vm0 = vcmask 130048   ;;  %v1585_v7 = vld [vmem:[#allocation2 + $0x38] sm:$0xff] }
   0xd   : > { %p207_p6 = scmp.lt.s32.totalorder %s1327_s24, 31  ;;  %317 = vmatpush.bf16.msra.mxu0 %v1577_v0  ;;  %452 = vmatpush.bf16.msra.mxu1 %v1585_v7  ;;  %v1584_v8 = vld [vmem:[#allocation2 + $0x30] sm:$0xff]  ;;  %v1583_v9 = vld [vmem:[#allocation2 + $0x28] sm:$0xff]  ;;  %v1582_v11 = vld [vmem:[#allocation2 + $0x20] sm:$0xff]  ;;  %vm1235_vm2 = vcmask 64512  }
   0xe   : > { %1626 = vmatpush.bf16.msra.mxu3 %v1585_v7  ;;  %v1581_v12 = vld [vmem:[#allocation2 + $0x18] sm:$0xff]  ;;  %v1580_v13 = vld [vmem:[#allocation2 + $0x10] sm:$0xff]  ;;  %v1579_v14 = vld [vmem:[#allocation2 + $0x8] sm:$0xff] }
   0xf   : > { %s2213_s24 = smov (!%p207_p6, %s1327_s24), 31  ;;  %v1578_v16 = vld [vmem:[#allocation2] sm:$0xff]  ;;  %v1593_v61 = vld [vmem:[#allocation2 + $0x78] sm:$0xff]  ;;  %v1592_v63 = vld [vmem:[#allocation2 + $0x70] sm:$0xff] }
  0x10   : > { %s1328_s25 = sshll.u32 %s2213_s24, 2  ;;  %v1973_v18 = vld [vmem:[%s2210_s3] ss:$0 sm:$0xff]  ;;  %1634 = vmatpush.bf16.msra.mxu2 %v1593_v61  ;;  %s1330_s18 = sshll.u32 %s2213_s24, 3 }
  0x11   : > { %s1949_s28 = scalar_lea.vmem %s2207_s0, %s1328_s25  ;;  %453 = vmatpush.bf16.msra.mxu1 %v1584_v8  ;;  %s2170_s23 = scalar_lea.vmem %s2211_s4, %s1330_s18 }
  0x12   : > { %v1569_v1 = vld [vmem:[%s1949_s28] sm:$0xff]  ;;  %v1570_v2 = vld [vmem:[%s1949_s28 + $0x8] sm:$0xff]  ;;  %v1571_v3 = vld [vmem:[%s1949_s28 + $0x10] sm:$0xff]  ;;  %1627 = vmatpush.bf16.msra.mxu3 %v1584_v8 }
  0x13   : > { %1367 = vmatmul.msk.bf16.vlgmr.msra.gmra.mxu0 %vm285_vm0, %v1569_v1  ;;  %v1572_v4 = vld [vmem:[%s1949_s28 + $0x18] sm:$0xff]  ;;  %v1573_v5 = vld [vmem:[%s1949_s28 + $0x20] sm:$0xff]  ;;  %v1574_v6 = vld [vmem:[%s1949_s28 + $0x28] sm:$0xff] }
  0x14   : > { %v1575_v10 = vld [vmem:[%s1949_s28 + $0x30] sm:$0xff]  ;;  %v1576_v15 = vld [vmem:[%s1949_s28 + $0x38] sm:$0xff]  ;;  %1635 = vmatpush.bf16.msra.mxu2 %v1592_v63 }
  0x15   : > { %454 = vmatpush.bf16.msra.mxu1 %v1583_v9  ;;  %v1589_v8 = vld [vmem:[#allocation2 + $0x58] sm:$0xff] }
  0x16   : > { %1628 = vmatpush.bf16.msra.mxu3 %v1583_v9 }
  0x19   : > { %455 = vmatpush.bf16.msra.mxu1 %v1582_v11 }
  0x1a   : > { %1629 = vmatpush.bf16.msra.mxu3 %v1582_v11  ;;  %v1588_v11 = vld [vmem:[#allocation2 + $0x50] sm:$0xff] }
  0x1d   : > { %456 = vmatpush.bf16.msra.mxu1 %v1581_v12 }
  0x1e   : > { %1630 = vmatpush.bf16.msra.mxu3 %v1581_v12 }
  0x21   : > { %457 = vmatpush.bf16.msra.mxu1 %v1580_v13 }
  0x22   : > { %1631 = vmatpush.bf16.msra.mxu3 %v1580_v13  ;;  %v1587_v13 = vld [vmem:[#allocation2 + $0x48] sm:$0xff] }
  0x23   : > { %1368 = vmatmul.msk.bf16.gmra.mxu0 %vm285_vm0, %v1570_v2  ;;  %v1591_v2 = vld [vmem:[#allocation2 + $0x68] sm:$0xff] }
  0x24   : > { %1636 = vmatpush.bf16.msra.mxu2 %v1591_v2 }
  0x25   : > { %458 = vmatpush.bf16.msra.mxu1 %v1579_v14 }
  0x26   : > { %1632 = vmatpush.bf16.msra.mxu3 %v1579_v14 }
  0x29   : > { %459 = vmatpush.bf16.msra.mxu1 %v1578_v16 }
  0x2a   : > { %1633 = vmatpush.bf16.msra.mxu3 %v1578_v16 }
  0x2d   : > { %592 = vmatpush.bf16.msrb.mxu1 %v1593_v61 }
  0x31   : > { %593 = vmatpush.bf16.msrb.mxu1 %v1592_v63 }
  0x33   : > { %1369 = vmatmul.msk.bf16.gmra.mxu0 %vm285_vm0, %v1571_v3 }
  0x35   : > { %594 = vmatpush.bf16.msrb.mxu1 %v1591_v2 }
  0x43   : > { %1370 = vmatmul.msk.bf16.gmra.mxu0 %vm285_vm0, %v1572_v4 }
  0x53   : > { %1371 = vmatmul.msk.bf16.gmra.mxu0 %vm285_vm0, %v1573_v5  ;;  %v1590_v5 = vld [vmem:[#allocation2 + $0x60] sm:$0xff] }
  0x54   : > { %595 = vmatpush.bf16.msrb.mxu1 %v1590_v5  ;;  %1637 = vmatpush.bf16.msra.mxu2 %v1590_v5 }
  0x58   : > { %596 = vmatpush.bf16.msrb.mxu1 %v1589_v8  ;;  %1638 = vmatpush.bf16.msra.mxu2 %v1589_v8 }
  0x5c   : > { %597 = vmatpush.bf16.msrb.mxu1 %v1588_v11  ;;  %1639 = vmatpush.bf16.msra.mxu2 %v1588_v11 }
  0x60   : > { %598 = vmatpush.bf16.msrb.mxu1 %v1587_v13  ;;  %1640 = vmatpush.bf16.msra.mxu2 %v1587_v13 }
  0x63   : > { %1372 = vmatmul.msk.bf16.gmra.mxu0 %vm285_vm0, %v1574_v6 }
  0x73   : > { %1373 = vmatmul.msk.bf16.gmra.mxu0 %vm285_vm0, %v1575_v10 }
  0x83   : > { %1374 = vmatmul.msk.bf16.gmra.mxu0 %vm285_vm0, %v1576_v15  ;;  %v1586_v15 = vld [vmem:[#allocation2 + $0x40] sm:$0xff] }
  0x84   : > { %599 = vmatpush.bf16.msrb.mxu1 %v1586_v15  ;;  %1641 = vmatpush.bf16.msra.mxu2 %v1586_v15  ;;  %v1594_v15 = vld [vmem:[#allocation2 + $0x80] sm:$0xff] }
  0x90   : > { %v319_v17 = vpop.f32.mrf.mxu0 }
  0x91   : > { %v320_v19 = vadd.f32 %v1973_v18, %v319_v17 }
  0x93   : > { %1670 = vtanh.f32 %v320_v19 }
  0x98   : > { %v321_v20 = vpop.f32.mrf.mxu0 }
  0x99   : > { %v322_v21 = vadd.f32 %v1973_v18, %v321_v20  ;;  %v1671_v22 = vpop.eup %1670  ;;  %v1994_v20 = vld [vmem:[%s2210_s3 + $0x1] ss:$0 sm:$0xff] }
  0x9b   : > { %1672 = vtanh.f32 %v322_v21 }
  0xa0   : > { %v324_v23 = vpop.f32.mrf.mxu0 }
  0xa1   : > { %v1673_v24 = vpop.eup %1672  ;;  %v325_v26 = vadd.f32 %v1973_v18, %v324_v23 }
  0xa2   : > { %v378_v25 = vpack.c.bf16 %v1673_v24, %v1671_v22 }
  0xa3   : > { %1674 = vtanh.f32 %v325_v26 }
  0xa4   : > { %460 = vmatmul.bf16.vlgmr.msra.gmra.mxu1 %v378_v25 }
  0xa8   : > { %v326_v27 = vpop.f32.mrf.mxu0 }
  0xa9   : > { %v327_v28 = vadd.f32 %v1973_v18, %v326_v27  ;;  %v1675_v29 = vpop.eup %1674 }
  0xab   : > { %1676 = vtanh.f32 %v327_v28 }
  0xb0   : > { %v329_v30 = vpop.f32.mrf.mxu0 }
  0xb1   : > { %v1677_v31 = vpop.eup %1676  ;;  %v330_v33 = vadd.f32 %v1973_v18, %v329_v30 }
  0xb2   : > { %v379_v32 = vpack.c.bf16 %v1677_v31, %v1675_v29 }
  0xb3   : > { %1678 = vtanh.f32 %v330_v33 }
  0xb4   : > { %465 = vmatmul.bf16.gmra.mxu1 %v379_v32 }
  0xb8   : > { %v331_v34 = vpop.f32.mrf.mxu0 }
  0xb9   : > { %v332_v35 = vadd.f32 %v1973_v18, %v331_v34  ;;  %v1679_v36 = vpop.eup %1678 }
  0xbb   : > { %1680 = vtanh.f32 %v332_v35 }
  0xc0   : > { %v334_v37 = vpop.f32.mrf.mxu0 }
  0xc1   : > { %v1681_v38 = vpop.eup %1680  ;;  %v335_v40 = vadd.f32 %v1973_v18, %v334_v37  ;;  %v1601_v37 = vld [vmem:[#allocation2 + $0xb8] sm:$0xff] }
  0xc2   : > { %v380_v39 = vpack.c.bf16 %v1681_v38, %v1679_v36  ;;  %732 = vmatpush.bf16.msrb.mxu3 %v1601_v37 }
  0xc3   : > { %1682 = vtanh.f32 %v335_v40 }
  0xc4   : > { %470 = vmatmul.bf16.vlgmr.msra.gmra.mxu3 %v380_v39 }
  0xc8   : > { %v336_v41 = vpop.f32.mrf.mxu0 }
  0xc9   : > { %v337_v42 = vadd.f32 %v1973_v18, %v336_v41  ;;  %v1683_v43 = vpop.eup %1682 }
  0xcb   : > { %1684 = vtanh.f32 %v337_v42  ;;  %v1600_v42 = vld [vmem:[#allocation2 + $0xb0] sm:$0xff] }
  0xcc   : > { %733 = vmatpush.bf16.msrb.mxu3 %v1600_v42 }
  0xd0   : > { %v339_v44 = vpop.f32.mrf.mxu0 }
  0xd1   : > { %v1685_v45 = vpop.eup %1684  ;;  %v340_v47 = vadd.f32 %v1973_v18, %v339_v44 }
  0xd2   : > { %v381_v46 = vpack.c.bf16 %v1685_v45, %v1683_v43 }
  0xd3   : > { %1686 = vtanh.f32 %v340_v47 }
  0xd4   : > { %475 = vmatmul.bf16.gmra.mxu3 %v381_v46 }
  0xd8   : > { %v341_v48 = vpop.f32.mrf.mxu0 }
  0xd9   : > { %v342_v49 = vadd.f32 %v1973_v18, %v341_v48  ;;  %v1687_v50 = vpop.eup %1686 }
  0xdb   : > { %1688 = vtanh.f32 %v342_v49 }
  0xe0   : > { %v344_v51 = vpop.f32.mrf.mxu0 }
  0xe1   : > { %v1689_v52 = vpop.eup %1688  ;;  %v345_v54 = vadd.f32 %v1973_v18, %v344_v51 }
  0xe2   : > { %v382_v53 = vpack.c.bf16 %v1689_v52, %v1687_v50  ;;  %v1599_v50 = vld [vmem:[#allocation2 + $0xa8] sm:$0xff] }
  0xe3   : > { %1690 = vtanh.f32 %v345_v54  ;;  %734 = vmatpush.bf16.msrb.mxu3 %v1599_v50  ;;  %v1598_v54 = vld [vmem:[#allocation2 + $0xa0] sm:$0xff] }
  0xe4   : > { %480 = vmatmul.bf16.gmra.mxu3 %v382_v53 }
  0xe7   : > { %735 = vmatpush.bf16.msrb.mxu3 %v1598_v54 }
  0xe8   : > { %v346_v55 = vpop.f32.mrf.mxu0 }
  0xe9   : > { %v347_v56 = vadd.f32 %v1973_v18, %v346_v55  ;;  %v1691_v57 = vpop.eup %1690 }
  0xeb   : > { %1692 = vtanh.f32 %v347_v56 }
  0xf0   : > { %v349_v58 = vpop.f32.mrf.mxu0 }
  0xf1   : > { %v1693_v59 = vpop.eup %1692  ;;  %v350_v62 = vadd.f32 %v1973_v18, %v349_v58 }
  0xf2   : > { %v383_v60 = vpack.c.bf16 %v1693_v59, %v1691_v57 }
  0xf3   : > { %1694 = vtanh.f32 %v350_v62  ;;  %v1597_v62 = vld [vmem:[#allocation2 + $0x98] sm:$0xff] }
  0xf4   : > { %485 = vmatmul.bf16.gmra.mxu3 %v383_v60 }
  0xf5   : > { %736 = vmatpush.bf16.msrb.mxu3 %v1597_v62 }
  0xf8   : > { %v351_v0 = vpop.f32.mrf.mxu0 }
  0xf9   : > { %v352_v1 = vadd.f32 %v1973_v18, %v351_v0  ;;  %v1695_v3 = vpop.eup %1694 }
  0xfb   : > { %1696 = vtanh.f32 %v352_v1 }
 0x100   : > { %v354_v4 = vpop.f32.mrf.mxu0 }
 0x101   : > { %v1697_v6 = vpop.eup %1696  ;;  %v355_v9 = vadd.f32 %v1973_v18, %v354_v4 }
 0x102   : > { %v384_v7 = vpack.c.bf16 %v1697_v6, %v1695_v3  ;;  %v1596_v3 = vld [vmem:[#allocation2 + $0x90] sm:$0xff] }
 0x103   : > { %1698 = vtanh.f32 %v355_v9  ;;  %737 = vmatpush.bf16.msrb.mxu3 %v1596_v3 }
 0x104   : > { %490 = vmatmul.bf16.gmra.mxu3 %v384_v7 }
 0x108   : > { %v356_v10 = vpop.f32.mrf.mxu0 }
 0x109   : > { %v357_v12 = vadd.f32 %v1973_v18, %v356_v10  ;;  %v1699_v14 = vpop.eup %1698 }
 0x10b   : > { %1700 = vtanh.f32 %v357_v12  ;;  %v1595_v12 = vld [vmem:[#allocation2 + $0x88] sm:$0xff] }
 0x10c   : > { %738 = vmatpush.bf16.msrb.mxu3 %v1595_v12 }
 0x110   : > { %739 = vmatpush.bf16.msrb.mxu3 %v1594_v15 }
 0x111   : > { %v1701_v16 = vpop.eup %1700 }
 0x112   : > { %v385_v17 = vpack.c.bf16 %v1701_v16, %v1699_v14 }
 0x114   : > { %495 = vmatmul.bf16.gmra.mxu3 %v385_v17 }
 0x121   : > { %v461_v19 = vpop.f32.mrf.mxu1 }
 0x122   : > { %v462_v18 = vadd.f32 %v1994_v20, %v461_v19 }
 0x124   : > { %1702 = vtanh.f32 %v462_v18 }
 0x129   : > { %v463_v21 = vpop.f32.mrf.mxu1 }
 0x12a   : > { %v464_v22 = vadd.f32 %v1994_v20, %v463_v21  ;;  %v1703_v23 = vpop.eup %1702  ;;  %v2015_v21 = vld [vmem:[%s2210_s3 + $0x2] ss:$0 sm:$0xff] }
 0x12c   : > { %1704 = vtanh.f32 %v464_v22 }
 0x131   : > { %v466_v24 = vpop.f32.mrf.mxu1 }
 0x132   : > { %v1705_v25 = vpop.eup %1704  ;;  %v467_v27 = vadd.f32 %v1994_v20, %v466_v24 }
 0x133   : > { %v517_v26 = vpack.c.bf16 %v1705_v25, %v1703_v23 }
 0x134   : > { %1706 = vtanh.f32 %v467_v27 }
 0x135   : > { %600 = vmatmul.bf16.vlgmr.msrb.gmra.mxu1 %v517_v26 }
 0x139   : > { %v468_v28 = vpop.f32.mrf.mxu1 }
 0x13a   : > { %v469_v29 = vadd.f32 %v1994_v20, %v468_v28  ;;  %v1707_v30 = vpop.eup %1706 }
 0x13c   : > { %1708 = vtanh.f32 %v469_v29  ;;  %v1609_v29 = vld [vmem:[#allocation2 + $0xf8] sm:$0xff] }
 0x13d   : > { %872 = vmatpush.bf16.msrb.mxu0 %v1609_v29 }
 0x142   : > { %v1709_v31 = vpop.eup %1708 }
 0x143   : > { %v518_v32 = vpack.c.bf16 %v1709_v31, %v1707_v30 }
 0x145   : > { %605 = vmatmul.bf16.gmra.mxu1 %v518_v32 }
 0x147   : > { %v471_v33 = vpop.f32.mrf.mxu3 }
 0x148   : > { %v472_v34 = vadd.f32 %v1994_v20, %v471_v33 }
 0x14a   : > { %1710 = vtanh.f32 %v472_v34 }
 0x14f   : > { %v473_v35 = vpop.f32.mrf.mxu3 }
 0x150   : > { %v474_v36 = vadd.f32 %v1994_v20, %v473_v35  ;;  %v1711_v38 = vpop.eup %1710  ;;  %v1608_v35 = vld [vmem:[#allocation2 + $0xf0] sm:$0xff] }
 0x151   : > { %873 = vmatpush.bf16.msrb.mxu0 %v1608_v35 }
 0x152   : > { %1712 = vtanh.f32 %v474_v36 }
 0x157   : > { %v476_v39 = vpop.f32.mrf.mxu3 }
 0x158   : > { %v1713_v40 = vpop.eup %1712  ;;  %v477_v43 = vadd.f32 %v1994_v20, %v476_v39 }
 0x159   : > { %v519_v41 = vpack.c.bf16 %v1713_v40, %v1711_v38  ;;  %v1607_v40 = vld [vmem:[#allocation2 + $0xe8] sm:$0xff] }
 0x15a   : > { %1714 = vtanh.f32 %v477_v43  ;;  %874 = vmatpush.bf16.msrb.mxu0 %v1607_v40 }
 0x15b   : > { %610 = vmatmul.bf16.vlgmr.msra.gmra.mxu2 %v519_v41 }
 0x15f   : > { %v478_v44 = vpop.f32.mrf.mxu3 }
 0x160   : > { %v479_v45 = vadd.f32 %v1994_v20, %v478_v44  ;;  %v1715_v46 = vpop.eup %1714 }
 0x162   : > { %1716 = vtanh.f32 %v479_v45 }
 0x167   : > { %v481_v47 = vpop.f32.mrf.mxu3 }
 0x168   : > { %v1717_v48 = vpop.eup %1716  ;;  %v482_v51 = vadd.f32 %v1994_v20, %v481_v47 }
 0x169   : > { %v520_v49 = vpack.c.bf16 %v1717_v48, %v1715_v46  ;;  %v1606_v48 = vld [vmem:[#allocation2 + $0xe0] sm:$0xff] }
 0x16a   : > { %1718 = vtanh.f32 %v482_v51  ;;  %875 = vmatpush.bf16.msrb.mxu0 %v1606_v48 }
 0x16b   : > { %615 = vmatmul.bf16.gmra.mxu2 %v520_v49 }
 0x16f   : > { %v483_v52 = vpop.f32.mrf.mxu3 }
 0x170   : > { %v484_v53 = vadd.f32 %v1994_v20, %v483_v52  ;;  %v1719_v55 = vpop.eup %1718 }
 0x172   : > { %1720 = vtanh.f32 %v484_v53 }
 0x177   : > { %v486_v56 = vpop.f32.mrf.mxu3 }
 0x178   : > { %v1721_v57 = vpop.eup %1720  ;;  %v487_v59 = vadd.f32 %v1994_v20, %v486_v56  ;;  %v1605_v56 = vld [vmem:[#allocation2 + $0xd8] sm:$0xff] }
 0x179   : > { %v521_v58 = vpack.c.bf16 %v1721_v57, %v1719_v55  ;;  %876 = vmatpush.bf16.msrb.mxu0 %v1605_v56 }
 0x17a   : > { %1722 = vtanh.f32 %v487_v59 }
 0x17b   : > { %620 = vmatmul.bf16.gmra.mxu2 %v521_v58 }
 0x17f   : > { %v488_v60 = vpop.f32.mrf.mxu3 }
 0x180   : > { %v489_v61 = vadd.f32 %v1994_v20, %v488_v60  ;;  %v1723_v63 = vpop.eup %1722 }
 0x182   : > { %1724 = vtanh.f32 %v489_v61 }
 0x187   : > { %v491_v0 = vpop.f32.mrf.mxu3 }
 0x188   : > { %v1725_v1 = vpop.eup %1724  ;;  %v492_v4 = vadd.f32 %v1994_v20, %v491_v0  ;;  %v1604_v0 = vld [vmem:[#allocation2 + $0xd0] sm:$0xff] }
 0x189   : > { %v522_v2 = vpack.c.bf16 %v1725_v1, %v1723_v63  ;;  %877 = vmatpush.bf16.msrb.mxu0 %v1604_v0 }
 0x18a   : > { %1726 = vtanh.f32 %v492_v4 }
 0x18b   : > { %625 = vmatmul.bf16.gmra.mxu2 %v522_v2 }
 0x18f   : > { %v493_v5 = vpop.f32.mrf.mxu3 }
 0x190   : > { %v494_v6 = vadd.f32 %v1994_v20, %v493_v5  ;;  %v1727_v7 = vpop.eup %1726 }
 0x192   : > { %1728 = vtanh.f32 %v494_v6 }
 0x197   : > { %v496_v8 = vpop.f32.mrf.mxu3 }
 0x198   : > { %v1729_v9 = vpop.eup %1728  ;;  %v497_v11 = vadd.f32 %v1994_v20, %v496_v8  ;;  %v1603_v8 = vld [vmem:[#allocation2 + $0xc8] sm:$0xff] }
 0x199   : > { %v523_v10 = vpack.c.bf16 %v1729_v9, %v1727_v7  ;;  %878 = vmatpush.bf16.msrb.mxu0 %v1603_v8  ;;  %v1612_v8 = vld [vmem:[#allocation2 + $0x110] sm:$0xff] }
 0x19a   : > { %1730 = vtanh.f32 %v497_v11 }
 0x19b   : > { %630 = vmatmul.bf16.gmra.mxu2 %v523_v10 }
 0x19f   : > { %v498_v13 = vpop.f32.mrf.mxu3 }
 0x1a0   : > { %v499_v14 = vadd.f32 %v1994_v20, %v498_v13  ;;  %v1731_v16 = vpop.eup %1730 }
 0x1a2   : > { %1732 = vtanh.f32 %v499_v14 }
 0x1a8   : > { %v1733_v17 = vpop.eup %1732 }
 0x1a9   : > { %v524_v19 = vpack.c.bf16 %v1733_v17, %v1731_v16  ;;  %v1602_v16 = vld [vmem:[#allocation2 + $0xc0] sm:$0xff] }
 0x1aa   : > { %879 = vmatpush.bf16.msrb.mxu0 %v1602_v16 }
 0x1ab   : > { %635 = vmatmul.bf16.gmra.mxu2 %v524_v19 }
 0x1b2   : > { %v601_v18 = vpop.f32.mrf.mxu1 }
 0x1b3   : > { %v602_v22 = vadd.f32 %v2015_v21, %v601_v18 }
 0x1b5   : > { %1734 = vtanh.f32 %v602_v22 }
 0x1ba   : > { %v603_v23 = vpop.f32.mrf.mxu1 }
 0x1bb   : > { %v604_v24 = vadd.f32 %v2015_v21, %v603_v23  ;;  %v1735_v20 = vpop.eup %1734  ;;  %v2036_v23 = vld [vmem:[%s2210_s3 + $0x3] ss:$0 sm:$0xff] }
 0x1bd   : > { %1736 = vtanh.f32 %v604_v24 }
 0x1c2   : > { %v606_v25 = vpop.f32.mrf.mxu1 }
 0x1c3   : > { %v1737_v26 = vpop.eup %1736  ;;  %v607_v28 = vadd.f32 %v2015_v21, %v606_v25 }
 0x1c4   : > { %v657_v27 = vpack.c.bf16 %v1737_v26, %v1735_v20 }
 0x1c5   : > { %1738 = vtanh.f32 %v607_v28 }
 0x1c6   : > { %740 = vmatmul.bf16.vlgmr.msrb.gmra.mxu3 %v657_v27 }
 0x1ca   : > { %v608_v30 = vpop.f32.mrf.mxu1 }
 0x1cb   : > { %v609_v31 = vadd.f32 %v2015_v21, %v608_v30  ;;  %v1739_v32 = vpop.eup %1738 }
 0x1cd   : > { %1740 = vtanh.f32 %v609_v31 }
 0x1d3   : > { %v1741_v33 = vpop.eup %1740 }
 0x1d4   : > { %v658_v34 = vpack.c.bf16 %v1741_v33, %v1739_v32 }
 0x1d6   : > { %745 = vmatmul.bf16.gmra.mxu3 %v658_v34 }
 0x1de   : > { %v611_v36 = vpop.f32.mrf.mxu2 }
 0x1df   : > { %v612_v37 = vadd.f32 %v2015_v21, %v611_v36 }
 0x1e1   : > { %1742 = vtanh.f32 %v612_v37 }
 0x1e6   : > { %v613_v38 = vpop.f32.mrf.mxu2 }
 0x1e7   : > { %v614_v39 = vadd.f32 %v2015_v21, %v613_v38  ;;  %v1743_v41 = vpop.eup %1742 }
 0x1e9   : > { %1744 = vtanh.f32 %v614_v39 }
 0x1ee   : > { %v616_v42 = vpop.f32.mrf.mxu2 }
 0x1ef   : > { %v1745_v43 = vpop.eup %1744  ;;  %v617_v45 = vadd.f32 %v2015_v21, %v616_v42 }
 0x1f0   : > { %v659_v44 = vpack.c.bf16 %v1745_v43, %v1743_v41 }
 0x1f1   : > { %1746 = vtanh.f32 %v617_v45 }
 0x1f2   : > { %750 = vmatmul.bf16.gmra.mxu3 %v659_v44 }
 0x1f6   : > { %v618_v46 = vpop.f32.mrf.mxu2 }
 0x1f7   : > { %v619_v47 = vadd.f32 %v2015_v21, %v618_v46  ;;  %v1747_v49 = vpop.eup %1746 }
 0x1f9   : > { %1748 = vtanh.f32 %v619_v47 }
 0x1fe   : > { %v621_v50 = vpop.f32.mrf.mxu2 }
 0x1ff   : > { %v1749_v51 = vpop.eup %1748  ;;  %v622_v53 = vadd.f32 %v2015_v21, %v621_v50 }
 0x200   : > { %v660_v52 = vpack.c.bf16 %v1749_v51, %v1747_v49 }
 0x201   : > { %1750 = vtanh.f32 %v622_v53 }
 0x202   : > { %755 = vmatmul.bf16.gmra.mxu3 %v660_v52 }
 0x206   : > { %v623_v54 = vpop.f32.mrf.mxu2 }
 0x207   : > { %v624_v55 = vadd.f32 %v2015_v21, %v623_v54  ;;  %v1751_v57 = vpop.eup %1750 }
 0x209   : > { %1752 = vtanh.f32 %v624_v55 }
 0x20e   : > { %v626_v58 = vpop.f32.mrf.mxu2 }
 0x20f   : > { %v1753_v59 = vpop.eup %1752  ;;  %v627_v61 = vadd.f32 %v2015_v21, %v626_v58 }
 0x210   : > { %v661_v60 = vpack.c.bf16 %v1753_v59, %v1751_v57 }
 0x211   : > { %1754 = vtanh.f32 %v627_v61  ;;  %v1616_v61 = vld [vmem:[#allocation2 + $0x130] sm:$0xff] }
 0x212   : > { %760 = vmatmul.bf16.gmra.mxu3 %v661_v60  ;;  %v1617_v60 = vld [vmem:[#allocation2 + $0x138] sm:$0xff] }
 0x213   : > { %1030 = vmatpush.bf16.msra.mxu1 %v1617_v60 }
 0x216   : > { %v628_v62 = vpop.f32.mrf.mxu2 }
 0x217   : > { %v629_v63 = vadd.f32 %v2015_v21, %v628_v62  ;;  %v1755_v1 = vpop.eup %1754  ;;  %1031 = vmatpush.bf16.msra.mxu1 %v1616_v61  ;;  %v1615_v62 = vld [vmem:[#allocation2 + $0x128] sm:$0xff] }
 0x219   : > { %1756 = vtanh.f32 %v629_v63 }
 0x21b   : > { %1032 = vmatpush.bf16.msra.mxu1 %v1615_v62 }
 0x21e   : > { %v631_v2 = vpop.f32.mrf.mxu2 }
 0x21f   : > { %v1757_v3 = vpop.eup %1756  ;;  %v632_v5 = vadd.f32 %v2015_v21, %v631_v2 }
 0x220   : > { %v662_v4 = vpack.c.bf16 %v1757_v3, %v1755_v1  ;;  %v1614_v3 = vld [vmem:[#allocation2 + $0x120] sm:$0xff] }
 0x221   : > { %1758 = vtanh.f32 %v632_v5  ;;  %1033 = vmatpush.bf16.msra.mxu1 %v1614_v3  ;;  %v1622_v3 = vld [vmem:[#allocation2 + $0x160] sm:$0xff] }
 0x222   : > { %765 = vmatmul.bf16.gmra.mxu3 %v662_v4 }
 0x226   : > { %v633_v6 = vpop.f32.mrf.mxu2 }
 0x227   : > { %v634_v7 = vadd.f32 %v2015_v21, %v633_v6  ;;  %v1759_v9 = vpop.eup %1758 }
 0x229   : > { %1760 = vtanh.f32 %v634_v7  ;;  %v1613_v7 = vld [vmem:[#allocation2 + $0x118] sm:$0xff] }
 0x22a   : > { %1034 = vmatpush.bf16.msra.mxu1 %v1613_v7 }
 0x22e   : > { %v636_v10 = vpop.f32.mrf.mxu2  ;;  %1035 = vmatpush.bf16.msra.mxu1 %v1612_v8 }
 0x22f   : > { %v1761_v11 = vpop.eup %1760  ;;  %v637_v13 = vadd.f32 %v2015_v21, %v636_v10 }
 0x230   : > { %v663_v12 = vpack.c.bf16 %v1761_v11, %v1759_v9 }
 0x231   : > { %1762 = vtanh.f32 %v637_v13 }
 0x232   : > { %770 = vmatmul.bf16.gmra.mxu3 %v663_v12  ;;  %v1611_v12 = vld [vmem:[#allocation2 + $0x108] sm:$0xff] }
 0x233   : > { %1036 = vmatpush.bf16.msra.mxu1 %v1611_v12 }
 0x236   : > { %v638_v14 = vpop.f32.mrf.mxu2 }
 0x237   : > { %v639_v15 = vadd.f32 %v2015_v21, %v638_v14  ;;  %v1763_v17 = vpop.eup %1762  ;;  %v1610_v14 = vld [vmem:[#allocation2 + $0x100] sm:$0xff] }
 0x238   : > { %1037 = vmatpush.bf16.msra.mxu1 %v1610_v14  ;;  %v1620_v14 = vld [vmem:[#allocation2 + $0x150] sm:$0xff] }
 0x239   : > { %1764 = vtanh.f32 %v639_v15 }
 0x23f   : > { %v1765_v19 = vpop.eup %1764 }
 0x240   : > { %v664_v18 = vpack.c.bf16 %v1765_v19, %v1763_v17 }
 0x242   : > { %775 = vmatmul.bf16.gmra.mxu3 %v664_v18 }
 0x249   : > { %v741_v22 = vpop.f32.mrf.mxu3 }
 0x24a   : > { %v742_v24 = vadd.f32 %v2036_v23, %v741_v22 }
 0x24c   : > { %1766 = vtanh.f32 %v742_v24 }
 0x251   : > { %v743_v20 = vpop.f32.mrf.mxu3 }
 0x252   : > { %v744_v25 = vadd.f32 %v2036_v23, %v743_v20  ;;  %v1767_v21 = vpop.eup %1766  ;;  %v2057_v20 = vld [vmem:[%s2210_s3 + $0x4] ss:$0 sm:$0xff] }
 0x254   : > { %1768 = vtanh.f32 %v744_v25 }
 0x259   : > { %v746_v26 = vpop.f32.mrf.mxu3 }
 0x25a   : > { %v1769_v27 = vpop.eup %1768  ;;  %v747_v29 = vadd.f32 %v2036_v23, %v746_v26 }
 0x25b   : > { %v797_v28 = vpack.c.bf16 %v1769_v27, %v1767_v21  ;;  %v375_v21 = vlaneseq }
 0x25c   : > { %1770 = vtanh.f32 %v747_v29 }
 0x25d   : > { %880 = vmatmul.bf16.vlgmr.msrb.gmra.mxu0 %v797_v28 }
 0x261   : > { %v748_v30 = vpop.f32.mrf.mxu3 }
 0x262   : > { %v749_v31 = vadd.f32 %v2036_v23, %v748_v30  ;;  %v1771_v32 = vpop.eup %1770 }
 0x264   : > { %1772 = vtanh.f32 %v749_v31 }
 0x26a   : > { %v1773_v33 = vpop.eup %1772 }
 0x26b   : > { %v798_v34 = vpack.c.bf16 %v1773_v33, %v1771_v32 }
 0x26d   : > { %885 = vmatmul.bf16.gmra.mxu0 %v798_v34 }
 0x275   : > { %v751_v35 = vpop.f32.mrf.mxu3 }
 0x276   : > { %v752_v36 = vadd.f32 %v2036_v23, %v751_v35 }
 0x278   : > { %1774 = vtanh.f32 %v752_v36 }
 0x27d   : > { %v753_v37 = vpop.f32.mrf.mxu3 }
 0x27e   : > { %v754_v38 = vadd.f32 %v2036_v23, %v753_v37  ;;  %v1775_v39 = vpop.eup %1774 }
 0x280   : > { %1776 = vtanh.f32 %v754_v38 }
 0x285   : > { %v756_v40 = vpop.f32.mrf.mxu3 }
 0x286   : > { %v1777_v41 = vpop.eup %1776  ;;  %v757_v43 = vadd.f32 %v2036_v23, %v756_v40 }
 0x287   : > { %v799_v42 = vpack.c.bf16 %v1777_v41, %v1775_v39 }
 0x288   : > { %1778 = vtanh.f32 %v757_v43 }
 0x289   : > { %890 = vmatmul.bf16.gmra.mxu0 %v799_v42 }
 0x28d   : > { %v758_v44 = vpop.f32.mrf.mxu3 }
 0x28e   : > { %v759_v45 = vadd.f32 %v2036_v23, %v758_v44  ;;  %v1779_v46 = vpop.eup %1778  ;;  %v1625_v44 = vld [vmem:[#allocation2 + $0x178] sm:$0xff] }
 0x28f   : > { %1186 = vmatpush.bf16.msrb.mxu2 %v1625_v44 }
 0x290   : > { %1780 = vtanh.f32 %v759_v45 }
 0x295   : > { %v761_v47 = vpop.f32.mrf.mxu3 }
 0x296   : > { %v1781_v48 = vpop.eup %1780  ;;  %v762_v50 = vadd.f32 %v2036_v23, %v761_v47 }
 0x297   : > { %v800_v49 = vpack.c.bf16 %v1781_v48, %v1779_v46 }
 0x298   : > { %1782 = vtanh.f32 %v762_v50 }
 0x299   : > { %895 = vmatmul.bf16.gmra.mxu0 %v800_v49 }
 0x29d   : > { %v763_v51 = vpop.f32.mrf.mxu3 }
 0x29e   : > { %v764_v52 = vadd.f32 %v2036_v23, %v763_v51  ;;  %v1783_v53 = vpop.eup %1782 }
 0x2a0   : > { %1784 = vtanh.f32 %v764_v52 }
 0x2a5   : > { %v766_v54 = vpop.f32.mrf.mxu3 }
 0x2a6   : > { %v1785_v55 = vpop.eup %1784  ;;  %v767_v57 = vadd.f32 %v2036_v23, %v766_v54 }
 0x2a7   : > { %v801_v56 = vpack.c.bf16 %v1785_v55, %v1783_v53  ;;  %v1624_v53 = vld [vmem:[#allocation2 + $0x170] sm:$0xff] }
 0x2a8   : > { %1786 = vtanh.f32 %v767_v57  ;;  %1187 = vmatpush.bf16.msrb.mxu2 %v1624_v53  ;;  %v1623_v57 = vld [vmem:[#allocation2 + $0x168] sm:$0xff] }
 0x2a9   : > { %900 = vmatmul.bf16.gmra.mxu0 %v801_v56 }
 0x2ac   : > { %1188 = vmatpush.bf16.msrb.mxu2 %v1623_v57 }
 0x2ad   : > { %v768_v58 = vpop.f32.mrf.mxu3 }
 0x2ae   : > { %v769_v59 = vadd.f32 %v2036_v23, %v768_v58  ;;  %v1787_v63 = vpop.eup %1786 }
 0x2b0   : > { %1788 = vtanh.f32 %v769_v59  ;;  %1189 = vmatpush.bf16.msrb.mxu2 %v1622_v3 }
 0x2b5   : > { %v771_v0 = vpop.f32.mrf.mxu3 }
 0x2b6   : > { %v1789_v1 = vpop.eup %1788  ;;  %v772_v4 = vadd.f32 %v2036_v23, %v771_v0 }
 0x2b7   : > { %v802_v2 = vpack.c.bf16 %v1789_v1, %v1787_v63 }
 0x2b8   : > { %1790 = vtanh.f32 %v772_v4 }
 0x2b9   : > { %905 = vmatmul.bf16.gmra.mxu0 %v802_v2 }
 0x2bd   : > { %v773_v5 = vpop.f32.mrf.mxu3 }
 0x2be   : > { %v774_v6 = vadd.f32 %v2036_v23, %v773_v5  ;;  %v1791_v9 = vpop.eup %1790 }
 0x2c0   : > { %1792 = vtanh.f32 %v774_v6 }
 0x2c5   : > { %v776_v10 = vpop.f32.mrf.mxu3 }
 0x2c6   : > { %v1793_v11 = vpop.eup %1792  ;;  %v777_v15 = vadd.f32 %v2036_v23, %v776_v10 }
 0x2c7   : > { %v803_v13 = vpack.c.bf16 %v1793_v11, %v1791_v9  ;;  %v1621_v11 = vld [vmem:[#allocation2 + $0x158] sm:$0xff] }
 0x2c8   : > { %1794 = vtanh.f32 %v777_v15  ;;  %1190 = vmatpush.bf16.msrb.mxu2 %v1621_v11 }
 0x2c9   : > { %910 = vmatmul.bf16.gmra.mxu0 %v803_v13 }
 0x2cc   : > { %1191 = vmatpush.bf16.msrb.mxu2 %v1620_v14 }
 0x2cd   : > { %v778_v16 = vpop.f32.mrf.mxu3 }
 0x2ce   : > { %v779_v17 = vadd.f32 %v2036_v23, %v778_v16  ;;  %v1795_v19 = vpop.eup %1794  ;;  %v2061_v23 = vand.u32 127, %v375_v21 }
 0x2d0   : > { %1796 = vtanh.f32 %v779_v17  ;;  %vm377_vm1 = vcmp.lt.s32.totalorder %v2061_v23, 80 }
 0x2d6   : > { %v1797_v18 = vpop.eup %1796 }
 0x2d7   : > { %v804_v22 = vpack.c.bf16 %v1797_v18, %v1795_v19 }
 0x2d9   : > { %915 = vmatmul.bf16.gmra.mxu0 %v804_v22 }
 0x2da   : > { %v881_v24 = vpop.f32.mrf.mxu0 }
 0x2db   : > { %v882_v25 = vadd.f32 %v2057_v20, %v881_v24 }
 0x2dd   : > { %1798 = vtanh.f32 %v882_v25 }
 0x2e2   : > { %v883_v26 = vpop.f32.mrf.mxu0 }
 0x2e3   : > { %v884_v27 = vadd.f32 %v2057_v20, %v883_v26  ;;  %v1799_v28 = vpop.eup %1798 }
 0x2e4   : > { %v939_v31 = vsel %vm377_vm1, %v1799_v28, %v882_v25 }
 0x2e5   : > { %1800 = vtanh.f32 %v884_v27 }
 0x2ea   : > { %v886_v29 = vpop.f32.mrf.mxu0 }
 0x2eb   : > { %v1801_v30 = vpop.eup %1800  ;;  %v887_v34 = vadd.f32 %v2057_v20, %v886_v29  ;;  %v1619_v29 = vld [vmem:[#allocation2 + $0x148] sm:$0xff] }
 0x2ec   : > { %v940_v32 = vsel %vm377_vm1, %v1801_v30, %v884_v27  ;;  %1192 = vmatpush.bf16.msrb.mxu2 %v1619_v29 }
 0x2ed   : > { %v955_v33 = vpack.c.bf16 %v940_v32, %v939_v31  ;;  %1802 = vtanh.f32 %v887_v34 }
 0x2ef   : > { %1038 = vmatmul.bf16.vlgmr.msra.gmra.mxu1 %v955_v33 }
 0x2f2   : > { %v888_v35 = vpop.f32.mrf.mxu0 }
 0x2f3   : > { %v889_v36 = vadd.f32 %v2057_v20, %v888_v35  ;;  %v1803_v37 = vpop.eup %1802 }
 0x2f4   : > { %v941_v39 = vsel %vm377_vm1, %v1803_v37, %v887_v34  ;;  %v1618_v34 = vld [vmem:[#allocation2 + $0x140] sm:$0xff] }
 0x2f5   : > { %1804 = vtanh.f32 %v889_v36  ;;  %1193 = vmatpush.bf16.msrb.mxu2 %v1618_v34 }
 0x2fb   : > { %v1805_v38 = vpop.eup %1804 }
 0x2fc   : > { %v942_v40 = vsel %vm377_vm1, %v1805_v38, %v889_v36 }
 0x2fd   : > { %v956_v41 = vpack.c.bf16 %v942_v40, %v941_v39 }
 0x2ff   : > { %1043 = vmatmul.bf16.gmra.mxu1 %v956_v41 }
 0x306   : > { %v891_v42 = vpop.f32.mrf.mxu0 }
 0x307   : > { %v892_v43 = vadd.f32 %v2057_v20, %v891_v42 }
 0x309   : > { %1806 = vtanh.f32 %v892_v43 }
 0x30e   : > { %v893_v45 = vpop.f32.mrf.mxu0 }
 0x30f   : > { %v894_v46 = vadd.f32 %v2057_v20, %v893_v45  ;;  %v1807_v47 = vpop.eup %1806 }
 0x310   : > { %v943_v50 = vsel %vm377_vm1, %v1807_v47, %v892_v43  ;;  %v2113_v43 = vld [vmem:[%s2210_s3 + $0x5] ss:$0 sm:$0xff] }
 0x311   : > { %1808 = vtanh.f32 %v894_v46 }
 0x316   : > { %v896_v48 = vpop.f32.mrf.mxu0 }
 0x317   : > { %v1809_v49 = vpop.eup %1808  ;;  %v897_v54 = vadd.f32 %v2057_v20, %v896_v48 }
 0x318   : > { %v944_v51 = vsel %vm377_vm1, %v1809_v49, %v894_v46 }
 0x319   : > { %v957_v52 = vpack.c.bf16 %v944_v51, %v943_v50  ;;  %1810 = vtanh.f32 %v897_v54 }
 0x31b   : > { %1048 = vmatmul.bf16.gmra.mxu1 %v957_v52 }
 0x31e   : > { %v898_v55 = vpop.f32.mrf.mxu0 }
 0x31f   : > { %v899_v56 = vadd.f32 %v2057_v20, %v898_v55  ;;  %v1811_v58 = vpop.eup %1810 }
 0x320   : > { %v945_v61 = vsel %vm377_vm1, %v1811_v58, %v897_v54 }
 0x321   : > { %1812 = vtanh.f32 %v899_v56 }
 0x326   : > { %v901_v59 = vpop.f32.mrf.mxu0 }
 0x327   : > { %v1813_v60 = vpop.eup %1812  ;;  %v902_v0 = vadd.f32 %v2057_v20, %v901_v59 }
 0x328   : > { %v946_v62 = vsel %vm377_vm1, %v1813_v60, %v899_v56 }
 0x329   : > { %v958_v63 = vpack.c.bf16 %v946_v62, %v945_v61  ;;  %1814 = vtanh.f32 %v902_v0 }
 0x32b   : > { %1053 = vmatmul.bf16.gmra.mxu1 %v958_v63 }
 0x32e   : > { %v903_v1 = vpop.f32.mrf.mxu0 }
 0x32f   : > { %v904_v2 = vadd.f32 %v2057_v20, %v903_v1  ;;  %v1815_v4 = vpop.eup %1814 }
 0x330   : > { %v947_v7 = vsel %vm377_vm1, %v1815_v4, %v902_v0 }
 0x331   : > { %1816 = vtanh.f32 %v904_v2 }
 0x336   : > { %v906_v5 = vpop.f32.mrf.mxu0 }
 0x337   : > { %v1817_v6 = vpop.eup %1816  ;;  %v907_v10 = vadd.f32 %v2057_v20, %v906_v5 }
 0x338   : > { %v948_v8 = vsel %vm377_vm1, %v1817_v6, %v904_v2 }
 0x339   : > { %v959_v9 = vpack.c.bf16 %v948_v8, %v947_v7  ;;  %1818 = vtanh.f32 %v907_v10 }
 0x33b   : > { %1058 = vmatmul.bf16.gmra.mxu1 %v959_v9 }
 0x33e   : > { %v908_v12 = vpop.f32.mrf.mxu0 }
 0x33f   : > { %v909_v13 = vadd.f32 %v2057_v20, %v908_v12  ;;  %v1819_v15 = vpop.eup %1818 }
 0x340   : > { %v949_v19 = vsel %vm377_vm1, %v1819_v15, %v907_v10 }
 0x341   : > { %1820 = vtanh.f32 %v909_v13 }
 0x346   : > { %v911_v16 = vpop.f32.mrf.mxu0 }
 0x347   : > { %v1821_v17 = vpop.eup %1820  ;;  %v912_v24 = vadd.f32 %v2057_v20, %v911_v16 }
 0x348   : > { %v950_v18 = vsel %vm377_vm1, %v1821_v17, %v909_v13 }
 0x349   : > { %v960_v22 = vpack.c.bf16 %v950_v18, %v949_v19  ;;  %1822 = vtanh.f32 %v912_v24 }
 0x34b   : > { %1063 = vmatmul.bf16.gmra.mxu1 %v960_v22 }
 0x34e   : > { %v913_v25 = vpop.f32.mrf.mxu0 }
 0x34f   : > { %v914_v21 = vadd.f32 %v2057_v20, %v913_v25  ;;  %v1823_v26 = vpop.eup %1822 }
 0x350   : > { %v951_v30 = vsel %vm377_vm1, %v1823_v26, %v912_v24 }
 0x351   : > { %1824 = vtanh.f32 %v914_v21 }
 0x356   : > { %v916_v27 = vpop.f32.mrf.mxu0 }
 0x357   : > { %v1825_v28 = vpop.eup %1824  ;;  %v917_v33 = vadd.f32 %v2057_v20, %v916_v27 }
 0x358   : > { %v952_v31 = vsel %vm377_vm1, %v1825_v28, %v914_v21 }
 0x359   : > { %v961_v32 = vpack.c.bf16 %v952_v31, %v951_v30  ;;  %1826 = vtanh.f32 %v917_v33 }
 0x35b   : > { %1068 = vmatmul.bf16.gmra.mxu1 %v961_v32 }
 0x35e   : > { %v918_v35 = vpop.f32.mrf.mxu0 }
 0x35f   : > { %v919_v36 = vadd.f32 %v2057_v20, %v918_v35  ;;  %v1827_v37 = vpop.eup %1826 }
 0x360   : > { %v953_v39 = vsel %vm377_vm1, %v1827_v37, %v917_v33 }
 0x361   : > { %1828 = vtanh.f32 %v919_v36 }
 0x367   : > { %v1829_v38 = vpop.eup %1828 }
 0x368   : > { %v954_v40 = vsel %vm377_vm1, %v1829_v38, %v919_v36 }
 0x369   : > { %v962_v41 = vpack.c.bf16 %v954_v40, %v953_v39 }
 0x36b   : > { %1073 = vmatmul.bf16.gmra.mxu1 %v962_v41 }
 0x36c   : > { %v1039_v42 = vpop.f32.mrf.mxu1 }
 0x36d   : > { %v1040_v44 = vadd.f32 %v2113_v43, %v1039_v42 }
 0x36f   : > { %1830 = vtanh.f32 %v1040_v44 }
 0x374   : > { %v1041_v20 = vpop.f32.mrf.mxu1 }
 0x375   : > { %v1042_v45 = vadd.f32 %v2113_v43, %v1041_v20  ;;  %v1831_v46 = vpop.eup %1830 }
 0x376   : > { %v1095_v49 = vsel %vm377_vm1, %v1831_v46, %v1040_v44 }
 0x377   : > { %1832 = vtanh.f32 %v1042_v45 }
 0x37c   : > { %v1044_v47 = vpop.f32.mrf.mxu1 }
 0x37d   : > { %v1833_v48 = vpop.eup %1832  ;;  %v1045_v52 = vadd.f32 %v2113_v43, %v1044_v47 }
 0x37e   : > { %v1096_v50 = vsel %vm377_vm1, %v1833_v48, %v1042_v45 }
 0x37f   : > { %v1111_v51 = vpack.c.bf16 %v1096_v50, %v1095_v49  ;;  %1834 = vtanh.f32 %v1045_v52 }
 0x381   : > { %1194 = vmatmul.bf16.vlgmr.msrb.gmra.mxu2 %v1111_v51 }
 0x384   : > { %v1046_v53 = vpop.f32.mrf.mxu1 }
 0x385   : > { %v1047_v54 = vadd.f32 %v2113_v43, %v1046_v53  ;;  %v1835_v55 = vpop.eup %1834 }
 0x386   : > { %v1097_v57 = vsel %vm377_vm1, %v1835_v55, %v1045_v52  ;;  %v1669_v52 = vld [vmem:[%s2210_s3 + $0x6] ss:$0 sm:$0xff] }
 0x387   : > { %1836 = vtanh.f32 %v1047_v54 }
 0x38d   : > { %v1837_v56 = vpop.eup %1836 }
 0x38e   : > { %v1098_v58 = vsel %vm377_vm1, %v1837_v56, %v1047_v54 }
 0x38f   : > { %v1112_v59 = vpack.c.bf16 %v1098_v58, %v1097_v57 }
 0x391   : > { %1199 = vmatmul.bf16.gmra.mxu2 %v1112_v59 }
 0x398   : > { %v1049_v60 = vpop.f32.mrf.mxu1 }
 0x399   : > { %v1050_v61 = vadd.f32 %v2113_v43, %v1049_v60 }
 0x39b   : > { %1838 = vtanh.f32 %v1050_v61 }
 0x3a0   : > { %v1051_v62 = vpop.f32.mrf.mxu1 }
 0x3a1   : > { %v1052_v63 = vadd.f32 %v2113_v43, %v1051_v62  ;;  %v1839_v0 = vpop.eup %1838 }
 0x3a2   : > { %v1099_v3 = vsel %vm377_vm1, %v1839_v0, %v1050_v61 }
 0x3a3   : > { %1840 = vtanh.f32 %v1052_v63 }
 0x3a8   : > { %v1054_v1 = vpop.f32.mrf.mxu1 }
 0x3a9   : > { %v1841_v2 = vpop.eup %1840  ;;  %v1055_v6 = vadd.f32 %v2113_v43, %v1054_v1 }
 0x3aa   : > { %v1100_v4 = vsel %vm377_vm1, %v1841_v2, %v1052_v63 }
 0x3ab   : > { %v1113_v5 = vpack.c.bf16 %v1100_v4, %v1099_v3  ;;  %1842 = vtanh.f32 %v1055_v6 }
 0x3ad   : > { %1204 = vmatmul.bf16.gmra.mxu2 %v1113_v5 }
 0x3b0   : > { %v1056_v7 = vpop.f32.mrf.mxu1 }
 0x3b1   : > { %v1057_v8 = vadd.f32 %v2113_v43, %v1056_v7  ;;  %v1843_v9 = vpop.eup %1842 }
 0x3b2   : > { %v1101_v12 = vsel %vm377_vm1, %v1843_v9, %v1055_v6 }
 0x3b3   : > { %1844 = vtanh.f32 %v1057_v8 }
 0x3b8   : > { %v1059_v10 = vpop.f32.mrf.mxu1 }
 0x3b9   : > { %v1845_v11 = vpop.eup %1844  ;;  %v1060_v15 = vadd.f32 %v2113_v43, %v1059_v10 }
 0x3ba   : > { %v1102_v13 = vsel %vm377_vm1, %v1845_v11, %v1057_v8 }
 0x3bb   : > { %v1114_v14 = vpack.c.bf16 %v1102_v13, %v1101_v12  ;;  %1846 = vtanh.f32 %v1060_v15 }
 0x3bd   : > { %1209 = vmatmul.bf16.gmra.mxu2 %v1114_v14 }
 0x3c0   : > { %v1061_v16 = vpop.f32.mrf.mxu1 }
 0x3c1   : > { %v1062_v17 = vadd.f32 %v2113_v43, %v1061_v16  ;;  %v1847_v19 = vpop.eup %1846 }
 0x3c2   : > { %v1103_v24 = vsel %vm377_vm1, %v1847_v19, %v1060_v15 }
 0x3c3   : > { %1848 = vtanh.f32 %v1062_v17 }
 0x3c8   : > { %v1064_v18 = vpop.f32.mrf.mxu1 }
 0x3c9   : > { %v1849_v22 = vpop.eup %1848  ;;  %v1065_v26 = vadd.f32 %v2113_v43, %v1064_v18 }
 0x3ca   : > { %v1104_v25 = vsel %vm377_vm1, %v1849_v22, %v1062_v17 }
 0x3cb   : > { %v1115_v21 = vpack.c.bf16 %v1104_v25, %v1103_v24  ;;  %1850 = vtanh.f32 %v1065_v26 }
 0x3cd   : > { %1214 = vmatmul.bf16.gmra.mxu2 %v1115_v21 }
 0x3d0   : > { %v1066_v27 = vpop.f32.mrf.mxu1 }
 0x3d1   : > { %v1067_v28 = vadd.f32 %v2113_v43, %v1066_v27  ;;  %v1851_v29 = vpop.eup %1850 }
 0x3d2   : > { %v1105_v32 = vsel %vm377_vm1, %v1851_v29, %v1065_v26 }
 0x3d3   : > { %1852 = vtanh.f32 %v1067_v28 }
 0x3d8   : > { %v1069_v30 = vpop.f32.mrf.mxu1 }
 0x3d9   : > { %v1853_v31 = vpop.eup %1852  ;;  %v1070_v35 = vadd.f32 %v2113_v43, %v1069_v30 }
 0x3da   : > { %v1106_v33 = vsel %vm377_vm1, %v1853_v31, %v1067_v28 }
 0x3db   : > { %v1116_v34 = vpack.c.bf16 %v1106_v33, %v1105_v32  ;;  %1854 = vtanh.f32 %v1070_v35 }
 0x3dd   : > { %1219 = vmatmul.bf16.gmra.mxu2 %v1116_v34 }
 0x3e0   : > { %v1071_v36 = vpop.f32.mrf.mxu1 }
 0x3e1   : > { %v1072_v37 = vadd.f32 %v2113_v43, %v1071_v36  ;;  %v1855_v38 = vpop.eup %1854 }
 0x3e2   : > { %v1107_v41 = vsel %vm377_vm1, %v1855_v38, %v1070_v35 }
 0x3e3   : > { %1856 = vtanh.f32 %v1072_v37 }
 0x3e8   : > { %v1074_v39 = vpop.f32.mrf.mxu1 }
 0x3e9   : > { %v1857_v40 = vpop.eup %1856  ;;  %v1075_v20 = vadd.f32 %v2113_v43, %v1074_v39 }
 0x3ea   : > { %v1108_v42 = vsel %vm377_vm1, %v1857_v40, %v1072_v37 }
 0x3eb   : > { %v1117_v44 = vpack.c.bf16 %v1108_v42, %v1107_v41  ;;  %1858 = vtanh.f32 %v1075_v20 }
 0x3ed   : > { %1224 = vmatmul.bf16.gmra.mxu2 %v1117_v44 }
 0x3f0   : > { %v1076_v45 = vpop.f32.mrf.mxu1 }
 0x3f1   : > { %v1077_v46 = vadd.f32 %v2113_v43, %v1076_v45  ;;  %v1859_v47 = vpop.eup %1858 }
 0x3f2   : > { %v1109_v49 = vsel %vm377_vm1, %v1859_v47, %v1075_v20 }
 0x3f3   : > { %1860 = vtanh.f32 %v1077_v46 }
 0x3f9   : > { %v1861_v48 = vpop.eup %1860 }
 0x3fa   : > { %v1110_v50 = vsel %vm377_vm1, %v1861_v48, %v1077_v46 }
 0x3fb   : > { %v1118_v51 = vpack.c.bf16 %v1110_v50, %v1109_v49 }
 0x3fd   : > { %1229 = vmatmul.bf16.gmra.mxu2 %v1118_v51 }
 0x404   : > { %v1195_v43 = vpop.f32.mrf.mxu2 }
 0x405   : > { %v1196_v23 = vadd.f32 %v1669_v52, %v1195_v43 }
 0x407   : > { %1236 = vst.msk [vmem:[%s2170_s23] sm:$0xff] %vm1235_vm2, %v1196_v23 }
 0x40c   : > { %v1197_v53 = vpop.f32.mrf.mxu2 }
 0x40d   : > { %v1198_v54 = vadd.f32 %v1669_v52, %v1197_v53 }
 0x40f   : > { %1237 = vst.msk [vmem:[%s2170_s23 + $0x8] sm:$0xff] %vm1235_vm2, %v1198_v54 }
 0x414   : > { %v1200_v55 = vpop.f32.mrf.mxu2 }
 0x415   : > { %v1201_v56 = vadd.f32 %v1669_v52, %v1200_v55 }
 0x417   : > { %1238 = vst.msk [vmem:[%s2170_s23 + $0x10] sm:$0xff] %vm1235_vm2, %v1201_v56 }
 0x41c   : > { %v1202_v57 = vpop.f32.mrf.mxu2 }
 0x41d   : > { %v1203_v58 = vadd.f32 %v1669_v52, %v1202_v57 }
 0x41f   : > { %1239 = vst.msk [vmem:[%s2170_s23 + $0x18] sm:$0xff] %vm1235_vm2, %v1203_v58 }
 0x430   : > { %v1205_v59 = vpop.f32.mrf.mxu2 }
 0x431   : > { %v1206_v60 = vadd.f32 %v1669_v52, %v1205_v59 }
 0x433   : > { %1240 = vst.msk [vmem:[%s2170_s23 + $0x20] sm:$0xff] %vm1235_vm2, %v1206_v60 }
 0x438   : > { %v1207_v61 = vpop.f32.mrf.mxu2 }
 0x439   : > { %v1208_v62 = vadd.f32 %v1669_v52, %v1207_v61 }
 0x43b   : > { %1241 = vst.msk [vmem:[%s2170_s23 + $0x28] sm:$0xff] %vm1235_vm2, %v1208_v62 }
 0x440   : > { %v1210_v63 = vpop.f32.mrf.mxu2 }
 0x441   : > { %v1211_v0 = vadd.f32 %v1669_v52, %v1210_v63 }
 0x443   : > { %1242 = vst.msk [vmem:[%s2170_s23 + $0x30] sm:$0xff] %vm1235_vm2, %v1211_v0 }
 0x448   : > { %v1212_v1 = vpop.f32.mrf.mxu2 }
 0x449   : > { %v1213_v2 = vadd.f32 %v1669_v52, %v1212_v1 }
 0x44b   : > { %1243 = vst.msk [vmem:[%s2170_s23 + $0x38] sm:$0xff] %vm1235_vm2, %v1213_v2 }
 0x450   : > { %v1215_v3 = vpop.f32.mrf.mxu2 }
 0x451   : > { %v1216_v4 = vadd.f32 %v1669_v52, %v1215_v3 }
 0x453   : > { %1244 = vst.msk [vmem:[%s2170_s23 + $0x40] sm:$0xff] %vm1235_vm2, %v1216_v4 }
 0x458   : > { %v1217_v5 = vpop.f32.mrf.mxu2 }
 0x459   : > { %v1218_v6 = vadd.f32 %v1669_v52, %v1217_v5 }
 0x45b   : > { %1245 = vst.msk [vmem:[%s2170_s23 + $0x48] sm:$0xff] %vm1235_vm2, %v1218_v6 }
 0x460   : > { %v1220_v7 = vpop.f32.mrf.mxu2 }
 0x461   : > { %v1221_v8 = vadd.f32 %v1669_v52, %v1220_v7 }
 0x463   : > { %1246 = vst.msk [vmem:[%s2170_s23 + $0x50] sm:$0xff] %vm1235_vm2, %v1221_v8 }
 0x468   : > { %v1222_v9 = vpop.f32.mrf.mxu2 }
 0x469   : > { %v1223_v10 = vadd.f32 %v1669_v52, %v1222_v9 }
 0x46b   : > { %1247 = vst.msk [vmem:[%s2170_s23 + $0x58] sm:$0xff] %vm1235_vm2, %v1223_v10 }
 0x470   : > { %v1225_v11 = vpop.f32.mrf.mxu2 }
 0x471   : > { %v1226_v12 = vadd.f32 %v1669_v52, %v1225_v11 }
 0x473   : > { %1248 = vst.msk [vmem:[%s2170_s23 + $0x60] sm:$0xff] %vm1235_vm2, %v1226_v12 }
 0x478   : > { %v1227_v13 = vpop.f32.mrf.mxu2 }
 0x479   : > { %v1228_v14 = vadd.f32 %v1669_v52, %v1227_v13 }
 0x47b   : > { %1249 = vst.msk [vmem:[%s2170_s23 + $0x68] sm:$0xff] %vm1235_vm2, %v1228_v14 }
 0x480   : > { %v1230_v15 = vpop.f32.mrf.mxu2 }
 0x481   : > { %v1231_v16 = vadd.f32 %v1669_v52, %v1230_v15 }
 0x483   : > { %1250 = vst.msk [vmem:[%s2170_s23 + $0x70] sm:$0xff] %vm1235_vm2, %v1231_v16 }
 0x488   : > { %v1232_v17 = vpop.f32.mrf.mxu2 }
 0x489   : > { %v1233_v19 = vadd.f32 %v1669_v52, %v1232_v17 }
 0x48b   : > { %1251 = vst.msk [vmem:[%s2170_s23 + $0x78] sm:$0xff] %vm1235_vm2, %v1233_v19 }
 0x48c PF: > { %s15_s15 = sadd.s32 1, %s1902_s15  }
 0x48d   : > { %p12_p7 = scmp.ge.s32.totalorder %s15_s15, 4  }
 0x48f   :  { %14 = sbr.rel (!%p12_p7) target bundleno = 1 (0x1), region = 76 }
 0x494   :  { %1274 = vsyncpa [#allocation3], 1 }
 0x495   :  { %1276 = vsyncpa [#allocation3 + $0x1], 1 }

// kernel: tpu_custom_call.1
= control target key start
LH: loop header
LB: loop body
LE: loop exit
PB: predicated region body
PF: predicated region fallthrough
CT: control target
= control target key end

     0   :  { %9 = vsyncpa [#allocation3], 0  ;;  %s1932_s15 = smov 0   ;;  %s2207_s0 = inlined_call_operand.vmem [shape: bf16[256,16], index: 0, kind: input, shape index: {}]   ;;  %s2208_s1 = inlined_call_operand.vmem [shape: bf16[16,128], index: 1, kind: input, shape index: {}]   ;;  %s2209_s2 = inlined_call_operand.hbm [shape: bf16[6,128,128], index: 2, kind: input, shape index: {}]   ;;  %s2210_s3 = inlined_call_operand.vmem [shape: f32[7,128], index: 3, kind: input, shape index: {}]   ;;  %s2211_s4 = inlined_call_operand.vmem [shape: f32[256,8], index: 4, kind: output, shape index: {}]  }
   0x1 LB: > { %s149_s18 = sshll.u32 %s2209_s2, 4  ;;  %s1320_s19 = sadd.s32 4294967295, %s1902_s15   ;;  %s1902_s15 = sphi %s1932_s15, %s15_s15   ;;  %s150_s18 = int_to_ptr.hbm [resolvable:$true] %s149_s18 }
   0x2   : > { %p1322_p0 = scmp.ge.s32.totalorder %s1902_s15, 1  ;;  %p135_p1 = scmp.lt.s32.totalorder %s1902_s15, 3 }
   0x3   : > { %p1650_p2 = scmp.eq.s32.totalorder %s1320_s19, 0  ;;  %s1904_s20 = smov [#allocation2]  }
   0x4   : > { %p136_p3 = pnand %p1322_p0, %p135_p1  ;;  %s151_s21 = sshll.u32 %s1904_s20, 4  ;;  %s152_s21 = int_to_ptr.vmem [resolvable:$true] %s151_s21 }
   0x5   : > { %s1905_s22 = smov 64   ;;  %s1906_s23 = smov 4  }
   0x6   : > { %p1646_p4 = pneg %p136_p3  ;;  %179 = sbr.rel (%p136_p3) target bundleno = 1164 (0x48c), region = 36 }
   0x8   : > { %p1647_p5 = pnand %p1650_p2, %p1646_p4 }
   0xa   : > { %1649 = dma.hbm_to_vmem [thread:$0]  (!%p1647_p5), %s150_s18, 6144, %s152_s21, [#allocation3], %s1905_s22, %s1905_s22, %s1906_s23  }
   0xb   : > { %1897 = dma.done.wait (%p1650_p2), [#allocation3], 6144  }
   0xc   : > { %1899 = vsyncadd (%p1650_p2), [#allocation3], 4294961152  ;;  %s1327_s24 = sshll.u32 %s1320_s19, 4  ;;  %v1577_v0 = vld [vmem:[%s2208_s1] sm:$0xff]  ;;  %vm285_vm0 = vcmask 130048   ;;  %v1585_v7 = vld [vmem:[#allocation2 + $0x38] sm:$0xff] }
   0xd   : > { %p207_p6 = scmp.lt.s32.totalorder %s1327_s24, 31  ;;  %317 = vmatpush.bf16.msra.mxu0 %v1577_v0  ;;  %452 = vmatpush.bf16.msra.mxu1 %v1585_v7  ;;  %v1584_v8 = vld [vmem:[#allocation2 + $0x30] sm:$0xff]  ;;  %v1583_v9 = vld [vmem:[#allocation2 + $0x28] sm:$0xff]  ;;  %v1582_v11 = vld [vmem:[#allocation2 + $0x20] sm:$0xff]  ;;  %vm1235_vm2 = vcmask 64512  }
   0xe   : > { %1626 = vmatpush.bf16.msra.mxu3 %v1585_v7  ;;  %v1581_v12 = vld [vmem:[#allocation2 + $0x18] sm:$0xff]  ;;  %v1580_v13 = vld [vmem:[#allocation2 + $0x10] sm:$0xff]  ;;  %v1579_v14 = vld [vmem:[#allocation2 + $0x8] sm:$0xff] }
   0xf   : > { %s2213_s24 = smov (!%p207_p6, %s1327_s24), 31  ;;  %v1578_v16 = vld [vmem:[#allocation2] sm:$0xff]  ;;  %v1593_v61 = vld [vmem:[#allocation2 + $0x78] sm:$0xff]  ;;  %v1592_v63 = vld [vmem:[#allocation2 + $0x70] sm:$0xff] }
  0x10   : > { %s1328_s25 = sshll.u32 %s2213_s24, 2  ;;  %v1973_v18 = vld [vmem:[%s2210_s3] ss:$0 sm:$0xff]  ;;  %1634 = vmatpush.bf16.msra.mxu2 %v1593_v61  ;;  %s1330_s18 = sshll.u32 %s2213_s24, 3 }
  0x11   : > { %s1949_s28 = scalar_lea.vmem %s2207_s0, %s1328_s25  ;;  %453 = vmatpush.bf16.msra.mxu1 %v1584_v8  ;;  %s2170_s23 = scalar_lea.vmem %s2211_s4, %s1330_s18 }
  0x12   : > { %v1569_v1 = vld [vmem:[%s1949_s28] sm:$0xff]  ;;  %v1570_v2 = vld [vmem:[%s1949_s28 + $0x8] sm:$0xff]  ;;  %v1571_v3 = vld [vmem:[%s1949_s28 + $0x10] sm:$0xff]  ;;  %1627 = vmatpush.bf16.msra.mxu3 %v1584_v8 }
  0x13   : > { %1367 = vmatmul.msk.bf16.vlgmr.msra.gmra.mxu0 %vm285_vm0, %v1569_v1  ;;  %v1572_v4 = vld [vmem:[%s1949_s28 + $0x18] sm:$0xff]  ;;  %v1573_v5 = vld [vmem:[%s1949_s28 + $0x20] sm:$0xff]  ;;  %v1574_v6 = vld [vmem:[%s1949_s28 + $0x28] sm:$0xff] }
  0x14   : > { %v1575_v10 = vld [vmem:[%s1949_s28 + $0x30] sm:$0xff]  ;;  %v1576_v15 = vld [vmem:[%s1949_s28 + $0x38] sm:$0xff]  ;;  %1635 = vmatpush.bf16.msra.mxu2 %v1592_v63 }
  0x15   : > { %454 = vmatpush.bf16.msra.mxu1 %v1583_v9  ;;  %v1589_v8 = vld [vmem:[#allocation2 + $0x58] sm:$0xff] }
  0x16   : > { %1628 = vmatpush.bf16.msra.mxu3 %v1583_v9 }
  0x19   : > { %455 = vmatpush.bf16.msra.mxu1 %v1582_v11 }
  0x1a   : > { %1629 = vmatpush.bf16.msra.mxu3 %v1582_v11  ;;  %v1588_v11 = vld [vmem:[#allocation2 + $0x50] sm:$0xff] }
  0x1d   : > { %456 = vmatpush.bf16.msra.mxu1 %v1581_v12 }
  0x1e   : > { %1630 = vmatpush.bf16.msra.mxu3 %v1581_v12 }
  0x21   : > { %457 = vmatpush.bf16.msra.mxu1 %v1580_v13 }
  0x22   : > { %1631 = vmatpush.bf16.msra.mxu3 %v1580_v13  ;;  %v1587_v13 = vld [vmem:[#allocation2 + $0x48] sm:$0xff] }
  0x23   : > { %1368 = vmatmul.msk.bf16.gmra.mxu0 %vm285_vm0, %v1570_v2  ;;  %v1591_v2 = vld [vmem:[#allocation2 + $0x68] sm:$0xff] }
  0x24   : > { %1636 = vmatpush.bf16.msra.mxu2 %v1591_v2 }
  0x25   : > { %458 = vmatpush.bf16.msra.mxu1 %v1579_v14 }
  0x26   : > { %1632 = vmatpush.bf16.msra.mxu3 %v1579_v14 }
  0x29   : > { %459 = vmatpush.bf16.msra.mxu1 %v1578_v16 }
  0x2a   : > { %1633 = vmatpush.bf16.msra.mxu3 %v1578_v16 }
  0x2d   : > { %592 = vmatpush.bf16.msrb.mxu1 %v1593_v61 }
  0x31   : > { %593 = vmatpush.bf16.msrb.mxu1 %v1592_v63 }
  0x33   : > { %1369 = vmatmul.msk.bf16.gmra.mxu0 %vm285_vm0, %v1571_v3 }
  0x35   : > { %594 = vmatpush.bf16.msrb.mxu1 %v1591_v2 }
  0x43   : > { %1370 = vmatmul.msk.bf16.gmra.mxu0 %vm285_vm0, %v1572_v4 }
  0x53   : > { %1371 = vmatmul.msk.bf16.gmra.mxu0 %vm285_vm0, %v1573_v5  ;;  %v1590_v5 = vld [vmem:[#allocation2 + $0x60] sm:$0xff] }
  0x54   : > { %595 = vmatpush.bf16.msrb.mxu1 %v1590_v5  ;;  %1637 = vmatpush.bf16.msra.mxu2 %v1590_v5 }
  0x58   : > { %596 = vmatpush.bf16.msrb.mxu1 %v1589_v8  ;;  %1638 = vmatpush.bf16.msra.mxu2 %v1589_v8 }
  0x5c   : > { %597 = vmatpush.bf16.msrb.mxu1 %v1588_v11  ;;  %1639 = vmatpush.bf16.msra.mxu2 %v1588_v11 }
  0x60   : > { %598 = vmatpush.bf16.msrb.mxu1 %v1587_v13  ;;  %1640 = vmatpush.bf16.msra.mxu2 %v1587_v13 }
  0x63   : > { %1372 = vmatmul.msk.bf16.gmra.mxu0 %vm285_vm0, %v1574_v6 }
  0x73   : > { %1373 = vmatmul.msk.bf16.gmra.mxu0 %vm285_vm0, %v1575_v10 }
  0x83   : > { %1374 = vmatmul.msk.bf16.gmra.mxu0 %vm285_vm0, %v1576_v15  ;;  %v1586_v15 = vld [vmem:[#allocation2 + $0x40] sm:$0xff] }
  0x84   : > { %599 = vmatpush.bf16.msrb.mxu1 %v1586_v15  ;;  %1641 = vmatpush.bf16.msra.mxu2 %v1586_v15  ;;  %v1594_v15 = vld [vmem:[#allocation2 + $0x80] sm:$0xff] }
  0x90   : > { %v319_v17 = vpop.f32.mrf.mxu0 }
  0x91   : > { %v320_v19 = vadd.f32 %v1973_v18, %v319_v17 }
  0x93   : > { %1670 = vtanh.f32 %v320_v19 }
  0x98   : > { %v321_v20 = vpop.f32.mrf.mxu0 }
  0x99   : > { %v322_v21 = vadd.f32 %v1973_v18, %v321_v20  ;;  %v1671_v22 = vpop.eup %1670  ;;  %v1994_v20 = vld [vmem:[%s2210_s3 + $0x1] ss:$0 sm:$0xff] }
  0x9b   : > { %1672 = vtanh.f32 %v322_v21 }
  0xa0   : > { %v324_v23 = vpop.f32.mrf.mxu0 }
  0xa1   : > { %v1673_v24 = vpop.eup %1672  ;;  %v325_v26 = vadd.f32 %v1973_v18, %v324_v23 }
  0xa2   : > { %v378_v25 = vpack.c.bf16 %v1673_v24, %v1671_v22 }
  0xa3   : > { %1674 = vtanh.f32 %v325_v26 }
  0xa4   : > { %460 = vmatmul.bf16.vlgmr.msra.gmra.mxu1 %v378_v25 }
  0xa8   : > { %v326_v27 = vpop.f32.mrf.mxu0 }
  0xa9   : > { %v327_v28 = vadd.f32 %v1973_v18, %v326_v27  ;;  %v1675_v29 = vpop.eup %1674 }
  0xab   : > { %1676 = vtanh.f32 %v327_v28 }
  0xb0   : > { %v329_v30 = vpop.f32.mrf.mxu0 }
  0xb1   : > { %v1677_v31 = vpop.eup %1676  ;;  %v330_v33 = vadd.f32 %v1973_v18, %v329_v30 }
  0xb2   : > { %v379_v32 = vpack.c.bf16 %v1677_v31, %v1675_v29 }
  0xb3   : > { %1678 = vtanh.f32 %v330_v33 }
  0xb4   : > { %465 = vmatmul.bf16.gmra.mxu1 %v379_v32 }
  0xb8   : > { %v331_v34 = vpop.f32.mrf.mxu0 }
  0xb9   : > { %v332_v35 = vadd.f32 %v1973_v18, %v331_v34  ;;  %v1679_v36 = vpop.eup %1678 }
  0xbb   : > { %1680 = vtanh.f32 %v332_v35 }
  0xc0   : > { %v334_v37 = vpop.f32.mrf.mxu0 }
  0xc1   : > { %v1681_v38 = vpop.eup %1680  ;;  %v335_v40 = vadd.f32 %v1973_v18, %v334_v37  ;;  %v1601_v37 = vld [vmem:[#allocation2 + $0xb8] sm:$0xff] }
  0xc2   : > { %v380_v39 = vpack.c.bf16 %v1681_v38, %v1679_v36  ;;  %732 = vmatpush.bf16.msrb.mxu3 %v1601_v37 }
  0xc3   : > { %1682 = vtanh.f32 %v335_v40 }
  0xc4   : > { %470 = vmatmul.bf16.vlgmr.msra.gmra.mxu3 %v380_v39 }
  0xc8   : > { %v336_v41 = vpop.f32.mrf.mxu0 }
  0xc9   : > { %v337_v42 = vadd.f32 %v1973_v18, %v336_v41  ;;  %v1683_v43 = vpop.eup %1682 }
  0xcb   : > { %1684 = vtanh.f32 %v337_v42  ;;  %v1600_v42 = vld [vmem:[#allocation2 + $0xb0] sm:$0xff] }
  0xcc   : > { %733 = vmatpush.bf16.msrb.mxu3 %v1600_v42 }
  0xd0   : > { %v339_v44 = vpop.f32.mrf.mxu0 }
  0xd1   : > { %v1685_v45 = vpop.eup %1684  ;;  %v340_v47 = vadd.f32 %v1973_v18, %v339_v44 }
  0xd2   : > { %v381_v46 = vpack.c.bf16 %v1685_v45, %v1683_v43 }
  0xd3   : > { %1686 = vtanh.f32 %v340_v47 }
  0xd4   : > { %475 = vmatmul.bf16.gmra.mxu3 %v381_v46 }
  0xd8   : > { %v341_v48 = vpop.f32.mrf.mxu0 }
  0xd9   : > { %v342_v49 = vadd.f32 %v1973_v18, %v341_v48  ;;  %v1687_v50 = vpop.eup %1686 }
  0xdb   : > { %1688 = vtanh.f32 %v342_v49 }
  0xe0   : > { %v344_v51 = vpop.f32.mrf.mxu0 }
  0xe1   : > { %v1689_v52 = vpop.eup %1688  ;;  %v345_v54 = vadd.f32 %v1973_v18, %v344_v51 }
  0xe2   : > { %v382_v53 = vpack.c.bf16 %v1689_v52, %v1687_v50  ;;  %v1599_v50 = vld [vmem:[#allocation2 + $0xa8] sm:$0xff] }
  0xe3   : > { %1690 = vtanh.f32 %v345_v54  ;;  %734 = vmatpush.bf16.msrb.mxu3 %v1599_v50  ;;  %v1598_v54 = vld [vmem:[#allocation2 + $0xa0] sm:$0xff] }
  0xe4   : > { %480 = vmatmul.bf16.gmra.mxu3 %v382_v53 }
  0xe7   : > { %735 = vmatpush.bf16.msrb.mxu3 %v1598_v54 }
  0xe8   : > { %v346_v55 = vpop.f32.mrf.mxu0 }
  0xe9   : > { %v347_v56 = vadd.f32 %v1973_v18, %v346_v55  ;;  %v1691_v57 = vpop.eup %1690 }
  0xeb   : > { %1692 = vtanh.f32 %v347_v56 }
  0xf0   : > { %v349_v58 = vpop.f32.mrf.mxu0 }
  0xf1   : > { %v1693_v59 = vpop.eup %1692  ;;  %v350_v62 = vadd.f32 %v1973_v18, %v349_v58 }
  0xf2   : > { %v383_v60 = vpack.c.bf16 %v1693_v59, %v1691_v57 }
  0xf3   : > { %1694 = vtanh.f32 %v350_v62  ;;  %v1597_v62 = vld [vmem:[#allocation2 + $0x98] sm:$0xff] }
  0xf4   : > { %485 = vmatmul.bf16.gmra.mxu3 %v383_v60 }
  0xf5   : > { %736 = vmatpush.bf16.msrb.mxu3 %v1597_v62 }
  0xf8   : > { %v351_v0 = vpop.f32.mrf.mxu0 }
  0xf9   : > { %v352_v1 = vadd.f32 %v1973_v18, %v351_v0  ;;  %v1695_v3 = vpop.eup %1694 }
  0xfb   : > { %1696 = vtanh.f32 %v352_v1 }
 0x100   : > { %v354_v4 = vpop.f32.mrf.mxu0 }
 0x101   : > { %v1697_v6 = vpop.eup %1696  ;;  %v355_v9 = vadd.f32 %v1973_v18, %v354_v4 }
 0x102   : > { %v384_v7 = vpack.c.bf16 %v1697_v6, %v1695_v3  ;;  %v1596_v3 = vld [vmem:[#allocation2 + $0x90] sm:$0xff] }
 0x103   : > { %1698 = vtanh.f32 %v355_v9  ;;  %737 = vmatpush.bf16.msrb.mxu3 %v1596_v3 }
 0x104   : > { %490 = vmatmul.bf16.gmra.mxu3 %v384_v7 }
 0x108   : > { %v356_v10 = vpop.f32.mrf.mxu0 }
 0x109   : > { %v357_v12 = vadd.f32 %v1973_v18, %v356_v10  ;;  %v1699_v14 = vpop.eup %1698 }
 0x10b   : > { %1700 = vtanh.f32 %v357_v12  ;;  %v1595_v12 = vld [vmem:[#allocation2 + $0x88] sm:$0xff] }
 0x10c   : > { %738 = vmatpush.bf16.msrb.mxu3 %v1595_v12 }
 0x110   : > { %739 = vmatpush.bf16.msrb.mxu3 %v1594_v15 }
 0x111   : > { %v1701_v16 = vpop.eup %1700 }
 0x112   : > { %v385_v17 = vpack.c.bf16 %v1701_v16, %v1699_v14 }
 0x114   : > { %495 = vmatmul.bf16.gmra.mxu3 %v385_v17 }
 0x121   : > { %v461_v19 = vpop.f32.mrf.mxu1 }
 0x122   : > { %v462_v18 = vadd.f32 %v1994_v20, %v461_v19 }
 0x124   : > { %1702 = vtanh.f32 %v462_v18 }
 0x129   : > { %v463_v21 = vpop.f32.mrf.mxu1 }
 0x12a   : > { %v464_v22 = vadd.f32 %v1994_v20, %v463_v21  ;;  %v1703_v23 = vpop.eup %1702  ;;  %v2015_v21 = vld [vmem:[%s2210_s3 + $0x2] ss:$0 sm:$0xff] }
 0x12c   : > { %1704 = vtanh.f32 %v464_v22 }
 0x131   : > { %v466_v24 = vpop.f32.mrf.mxu1 }
 0x132   : > { %v1705_v25 = vpop.eup %1704  ;;  %v467_v27 = vadd.f32 %v1994_v20, %v466_v24 }
 0x133   : > { %v517_v26 = vpack.c.bf16 %v1705_v25, %v1703_v23 }
 0x134   : > { %1706 = vtanh.f32 %v467_v27 }
 0x135   : > { %600 = vmatmul.bf16.vlgmr.msrb.gmra.mxu1 %v517_v26 }
 0x139   : > { %v468_v28 = vpop.f32.mrf.mxu1 }
 0x13a   : > { %v469_v29 = vadd.f32 %v1994_v20, %v468_v28  ;;  %v1707_v30 = vpop.eup %1706 }
 0x13c   : > { %1708 = vtanh.f32 %v469_v29  ;;  %v1609_v29 = vld [vmem:[#allocation2 + $0xf8] sm:$0xff] }
 0x13d   : > { %872 = vmatpush.bf16.msrb.mxu0 %v1609_v29 }
 0x142   : > { %v1709_v31 = vpop.eup %1708 }
 0x143   : > { %v518_v32 = vpack.c.bf16 %v1709_v31, %v1707_v30 }
 0x145   : > { %605 = vmatmul.bf16.gmra.mxu1 %v518_v32 }
 0x147   : > { %v471_v33 = vpop.f32.mrf.mxu3 }
 0x148   : > { %v472_v34 = vadd.f32 %v1994_v20, %v471_v33 }
 0x14a   : > { %1710 = vtanh.f32 %v472_v34 }
 0x14f   : > { %v473_v35 = vpop.f32.mrf.mxu3 }
 0x150   : > { %v474_v36 = vadd.f32 %v1994_v20, %v473_v35  ;;  %v1711_v38 = vpop.eup %1710  ;;  %v1608_v35 = vld [vmem:[#allocation2 + $0xf0] sm:$0xff] }
 0x151   : > { %873 = vmatpush.bf16.msrb.mxu0 %v1608_v35 }
 0x152   : > { %1712 = vtanh.f32 %v474_v36 }
 0x157   : > { %v476_v39 = vpop.f32.mrf.mxu3 }
 0x158   : > { %v1713_v40 = vpop.eup %1712  ;;  %v477_v43 = vadd.f32 %v1994_v20, %v476_v39 }
 0x159   : > { %v519_v41 = vpack.c.bf16 %v1713_v40, %v1711_v38  ;;  %v1607_v40 = vld [vmem:[#allocation2 + $0xe8] sm:$0xff] }
 0x15a   : > { %1714 = vtanh.f32 %v477_v43  ;;  %874 = vmatpush.bf16.msrb.mxu0 %v1607_v40 }
 0x15b   : > { %610 = vmatmul.bf16.vlgmr.msra.gmra.mxu2 %v519_v41 }
 0x15f   : > { %v478_v44 = vpop.f32.mrf.mxu3 }
 0x160   : > { %v479_v45 = vadd.f32 %v1994_v20, %v478_v44  ;;  %v1715_v46 = vpop.eup %1714 }
 0x162   : > { %1716 = vtanh.f32 %v479_v45 }
 0x167   : > { %v481_v47 = vpop.f32.mrf.mxu3 }
 0x168   : > { %v1717_v48 = vpop.eup %1716  ;;  %v482_v51 = vadd.f32 %v1994_v20, %v481_v47 }
 0x169   : > { %v520_v49 = vpack.c.bf16 %v1717_v48, %v1715_v46  ;;  %v1606_v48 = vld [vmem:[#allocation2 + $0xe0] sm:$0xff] }
 0x16a   : > { %1718 = vtanh.f32 %v482_v51  ;;  %875 = vmatpush.bf16.msrb.mxu0 %v1606_v48 }
 0x16b   : > { %615 = vmatmul.bf16.gmra.mxu2 %v520_v49 }
 0x16f   : > { %v483_v52 = vpop.f32.mrf.mxu3 }
 0x170   : > { %v484_v53 = vadd.f32 %v1994_v20, %v483_v52  ;;  %v1719_v55 = vpop.eup %1718 }
 0x172   : > { %1720 = vtanh.f32 %v484_v53 }
 0x177   : > { %v486_v56 = vpop.f32.mrf.mxu3 }
 0x178   : > { %v1721_v57 = vpop.eup %1720  ;;  %v487_v59 = vadd.f32 %v1994_v20, %v486_v56  ;;  %v1605_v56 = vld [vmem:[#allocation2 + $0xd8] sm:$0xff] }
 0x179   : > { %v521_v58 = vpack.c.bf16 %v1721_v57, %v1719_v55  ;;  %876 = vmatpush.bf16.msrb.mxu0 %v1605_v56 }
 0x17a   : > { %1722 = vtanh.f32 %v487_v59 }
 0x17b   : > { %620 = vmatmul.bf16.gmra.mxu2 %v521_v58 }
 0x17f   : > { %v488_v60 = vpop.f32.mrf.mxu3 }
 0x180   : > { %v489_v61 = vadd.f32 %v1994_v20, %v488_v60  ;;  %v1723_v63 = vpop.eup %1722 }
 0x182   : > { %1724 = vtanh.f32 %v489_v61 }
 0x187   : > { %v491_v0 = vpop.f32.mrf.mxu3 }
 0x188   : > { %v1725_v1 = vpop.eup %1724  ;;  %v492_v4 = vadd.f32 %v1994_v20, %v491_v0  ;;  %v1604_v0 = vld [vmem:[#allocation2 + $0xd0] sm:$0xff] }
 0x189   : > { %v522_v2 = vpack.c.bf16 %v1725_v1, %v1723_v63  ;;  %877 = vmatpush.bf16.msrb.mxu0 %v1604_v0 }
 0x18a   : > { %1726 = vtanh.f32 %v492_v4 }
 0x18b   : > { %625 = vmatmul.bf16.gmra.mxu2 %v522_v2 }
 0x18f   : > { %v493_v5 = vpop.f32.mrf.mxu3 }
 0x190   : > { %v494_v6 = vadd.f32 %v1994_v20, %v493_v5  ;;  %v1727_v7 = vpop.eup %1726 }
 0x192   : > { %1728 = vtanh.f32 %v494_v6 }
 0x197   : > { %v496_v8 = vpop.f32.mrf.mxu3 }
 0x198   : > { %v1729_v9 = vpop.eup %1728  ;;  %v497_v11 = vadd.f32 %v1994_v20, %v496_v8  ;;  %v1603_v8 = vld [vmem:[#allocation2 + $0xc8] sm:$0xff] }
 0x199   : > { %v523_v10 = vpack.c.bf16 %v1729_v9, %v1727_v7  ;;  %878 = vmatpush.bf16.msrb.mxu0 %v1603_v8  ;;  %v1612_v8 = vld [vmem:[#allocation2 + $0x110] sm:$0xff] }
 0x19a   : > { %1730 = vtanh.f32 %v497_v11 }
 0x19b   : > { %630 = vmatmul.bf16.gmra.mxu2 %v523_v10 }
 0x19f   : > { %v498_v13 = vpop.f32.mrf.mxu3 }
 0x1a0   : > { %v499_v14 = vadd.f32 %v1994_v20, %v498_v13  ;;  %v1731_v16 = vpop.eup %1730 }
 0x1a2   : > { %1732 = vtanh.f32 %v499_v14 }
 0x1a8   : > { %v1733_v17 = vpop.eup %1732 }
 0x1a9   : > { %v524_v19 = vpack.c.bf16 %v1733_v17, %v1731_v16  ;;  %v1602_v16 = vld [vmem:[#allocation2 + $0xc0] sm:$0xff] }
 0x1aa   : > { %879 = vmatpush.bf16.msrb.mxu0 %v1602_v16 }
 0x1ab   : > { %635 = vmatmul.bf16.gmra.mxu2 %v524_v19 }
 0x1b2   : > { %v601_v18 = vpop.f32.mrf.mxu1 }
 0x1b3   : > { %v602_v22 = vadd.f32 %v2015_v21, %v601_v18 }
 0x1b5   : > { %1734 = vtanh.f32 %v602_v22 }
 0x1ba   : > { %v603_v23 = vpop.f32.mrf.mxu1 }
 0x1bb   : > { %v604_v24 = vadd.f32 %v2015_v21, %v603_v23  ;;  %v1735_v20 = vpop.eup %1734  ;;  %v2036_v23 = vld [vmem:[%s2210_s3 + $0x3] ss:$0 sm:$0xff] }
 0x1bd   : > { %1736 = vtanh.f32 %v604_v24 }
 0x1c2   : > { %v606_v25 = vpop.f32.mrf.mxu1 }
 0x1c3   : > { %v1737_v26 = vpop.eup %1736  ;;  %v607_v28 = vadd.f32 %v2015_v21, %v606_v25 }
 0x1c4   : > { %v657_v27 = vpack.c.bf16 %v1737_v26, %v1735_v20 }
 0x1c5   : > { %1738 = vtanh.f32 %v607_v28 }
 0x1c6   : > { %740 = vmatmul.bf16.vlgmr.msrb.gmra.mxu3 %v657_v27 }
 0x1ca   : > { %v608_v30 = vpop.f32.mrf.mxu1 }
 0x1cb   : > { %v609_v31 = vadd.f32 %v2015_v21, %v608_v30  ;;  %v1739_v32 = vpop.eup %1738 }
 0x1cd   : > { %1740 = vtanh.f32 %v609_v31 }
 0x1d3   : > { %v1741_v33 = vpop.eup %1740 }
 0x1d4   : > { %v658_v34 = vpack.c.bf16 %v1741_v33, %v1739_v32 }
 0x1d6   : > { %745 = vmatmul.bf16.gmra.mxu3 %v658_v34 }
 0x1de   : > { %v611_v36 = vpop.f32.mrf.mxu2 }
 0x1df   : > { %v612_v37 = vadd.f32 %v2015_v21, %v611_v36 }
 0x1e1   : > { %1742 = vtanh.f32 %v612_v37 }
 0x1e6   : > { %v613_v38 = vpop.f32.mrf.mxu2 }
 0x1e7   : > { %v614_v39 = vadd.f32 %v2015_v21, %v613_v38  ;;  %v1743_v41 = vpop.eup %1742 }
 0x1e9   : > { %1744 = vtanh.f32 %v614_v39 }
 0x1ee   : > { %v616_v42 = vpop.f32.mrf.mxu2 }
 0x1ef   : > { %v1745_v43 = vpop.eup %1744  ;;  %v617_v45 = vadd.f32 %v2015_v21, %v616_v42 }
 0x1f0   : > { %v659_v44 = vpack.c.bf16 %v1745_v43, %v1743_v41 }
 0x1f1   : > { %1746 = vtanh.f32 %v617_v45 }
 0x1f2   : > { %750 = vmatmul.bf16.gmra.mxu3 %v659_v44 }
 0x1f6   : > { %v618_v46 = vpop.f32.mrf.mxu2 }
 0x1f7   : > { %v619_v47 = vadd.f32 %v2015_v21, %v618_v46  ;;  %v1747_v49 = vpop.eup %1746 }
 0x1f9   : > { %1748 = vtanh.f32 %v619_v47 }
 0x1fe   : > { %v621_v50 = vpop.f32.mrf.mxu2 }
 0x1ff   : > { %v1749_v51 = vpop.eup %1748  ;;  %v622_v53 = vadd.f32 %v2015_v21, %v621_v50 }
 0x200   : > { %v660_v52 = vpack.c.bf16 %v1749_v51, %v1747_v49 }
 0x201   : > { %1750 = vtanh.f32 %v622_v53 }
 0x202   : > { %755 = vmatmul.bf16.gmra.mxu3 %v660_v52 }
 0x206   : > { %v623_v54 = vpop.f32.mrf.mxu2 }
 0x207   : > { %v624_v55 = vadd.f32 %v2015_v21, %v623_v54  ;;  %v1751_v57 = vpop.eup %1750 }
 0x209   : > { %1752 = vtanh.f32 %v624_v55 }
 0x20e   : > { %v626_v58 = vpop.f32.mrf.mxu2 }
 0x20f   : > { %v1753_v59 = vpop.eup %1752  ;;  %v627_v61 = vadd.f32 %v2015_v21, %v626_v58 }
 0x210   : > { %v661_v60 = vpack.c.bf16 %v1753_v59, %v1751_v57 }
 0x211   : > { %1754 = vtanh.f32 %v627_v61  ;;  %v1616_v61 = vld [vmem:[#allocation2 + $0x130] sm:$0xff] }
 0x212   : > { %760 = vmatmul.bf16.gmra.mxu3 %v661_v60  ;;  %v1617_v60 = vld [vmem:[#allocation2 + $0x138] sm:$0xff] }
 0x213   : > { %1030 = vmatpush.bf16.msra.mxu1 %v1617_v60 }
 0x216   : > { %v628_v62 = vpop.f32.mrf.mxu2 }
 0x217   : > { %v629_v63 = vadd.f32 %v2015_v21, %v628_v62  ;;  %v1755_v1 = vpop.eup %1754  ;;  %1031 = vmatpush.bf16.msra.mxu1 %v1616_v61  ;;  %v1615_v62 = vld [vmem:[#allocation2 + $0x128] sm:$0xff] }
 0x219   : > { %1756 = vtanh.f32 %v629_v63 }
 0x21b   : > { %1032 = vmatpush.bf16.msra.mxu1 %v1615_v62 }
 0x21e   : > { %v631_v2 = vpop.f32.mrf.mxu2 }
 0x21f   : > { %v1757_v3 = vpop.eup %1756  ;;  %v632_v5 = vadd.f32 %v2015_v21, %v631_v2 }
 0x220   : > { %v662_v4 = vpack.c.bf16 %v1757_v3, %v1755_v1  ;;  %v1614_v3 = vld [vmem:[#allocation2 + $0x120] sm:$0xff] }
 0x221   : > { %1758 = vtanh.f32 %v632_v5  ;;  %1033 = vmatpush.bf16.msra.mxu1 %v1614_v3  ;;  %v1622_v3 = vld [vmem:[#allocation2 + $0x160] sm:$0xff] }
 0x222   : > { %765 = vmatmul.bf16.gmra.mxu3 %v662_v4 }
 0x226   : > { %v633_v6 = vpop.f32.mrf.mxu2 }
 0x227   : > { %v634_v7 = vadd.f32 %v2015_v21, %v633_v6  ;;  %v1759_v9 = vpop.eup %1758 }
 0x229   : > { %1760 = vtanh.f32 %v634_v7  ;;  %v1613_v7 = vld [vmem:[#allocation2 + $0x118] sm:$0xff] }
 0x22a   : > { %1034 = vmatpush.bf16.msra.mxu1 %v1613_v7 }
 0x22e   : > { %v636_v10 = vpop.f32.mrf.mxu2  ;;  %1035 = vmatpush.bf16.msra.mxu1 %v1612_v8 }
 0x22f   : > { %v1761_v11 = vpop.eup %1760  ;;  %v637_v13 = vadd.f32 %v2015_v21, %v636_v10 }
 0x230   : > { %v663_v12 = vpack.c.bf16 %v1761_v11, %v1759_v9 }
 0x231   : > { %1762 = vtanh.f32 %v637_v13 }
 0x232   : > { %770 = vmatmul.bf16.gmra.mxu3 %v663_v12  ;;  %v1611_v12 = vld [vmem:[#allocation2 + $0x108] sm:$0xff] }
 0x233   : > { %1036 = vmatpush.bf16.msra.mxu1 %v1611_v12 }
 0x236   : > { %v638_v14 = vpop.f32.mrf.mxu2 }
 0x237   : > { %v639_v15 = vadd.f32 %v2015_v21, %v638_v14  ;;  %v1763_v17 = vpop.eup %1762  ;;  %v1610_v14 = vld [vmem:[#allocation2 + $0x100] sm:$0xff] }
 0x238   : > { %1037 = vmatpush.bf16.msra.mxu1 %v1610_v14  ;;  %v1620_v14 = vld [vmem:[#allocation2 + $0x150] sm:$0xff] }
 0x239   : > { %1764 = vtanh.f32 %v639_v15 }
 0x23f   : > { %v1765_v19 = vpop.eup %1764 }
 0x240   : > { %v664_v18 = vpack.c.bf16 %v1765_v19, %v1763_v17 }
 0x242   : > { %775 = vmatmul.bf16.gmra.mxu3 %v664_v18 }
 0x249   : > { %v741_v22 = vpop.f32.mrf.mxu3 }
 0x24a   : > { %v742_v24 = vadd.f32 %v2036_v23, %v741_v22 }
 0x24c   : > { %1766 = vtanh.f32 %v742_v24 }
 0x251   : > { %v743_v20 = vpop.f32.mrf.mxu3 }
 0x252   : > { %v744_v25 = vadd.f32 %v2036_v23, %v743_v20  ;;  %v1767_v21 = vpop.eup %1766  ;;  %v2057_v20 = vld [vmem:[%s2210_s3 + $0x4] ss:$0 sm:$0xff] }
 0x254   : > { %1768 = vtanh.f32 %v744_v25 }
 0x259   : > { %v746_v26 = vpop.f32.mrf.mxu3 }
 0x25a   : > { %v1769_v27 = vpop.eup %1768  ;;  %v747_v29 = vadd.f32 %v2036_v23, %v746_v26 }
 0x25b   : > { %v797_v28 = vpack.c.bf16 %v1769_v27, %v1767_v21  ;;  %v375_v21 = vlaneseq }
 0x25c   : > { %1770 = vtanh.f32 %v747_v29 }
 0x25d   : > { %880 = vmatmul.bf16.vlgmr.msrb.gmra.mxu0 %v797_v28 }
 0x261   : > { %v748_v30 = vpop.f32.mrf.mxu3 }
 0x262   : > { %v749_v31 = vadd.f32 %v2036_v23, %v748_v30  ;;  %v1771_v32 = vpop.eup %1770 }
 0x264   : > { %1772 = vtanh.f32 %v749_v31 }
 0x26a   : > { %v1773_v33 = vpop.eup %1772 }
 0x26b   : > { %v798_v34 = vpack.c.bf16 %v1773_v33, %v1771_v32 }
 0x26d   : > { %885 = vmatmul.bf16.gmra.mxu0 %v798_v34 }
 0x275   : > { %v751_v35 = vpop.f32.mrf.mxu3 }
 0x276   : > { %v752_v36 = vadd.f32 %v2036_v23, %v751_v35 }
 0x278   : > { %1774 = vtanh.f32 %v752_v36 }
 0x27d   : > { %v753_v37 = vpop.f32.mrf.mxu3 }
 0x27e   : > { %v754_v38 = vadd.f32 %v2036_v23, %v753_v37  ;;  %v1775_v39 = vpop.eup %1774 }
 0x280   : > { %1776 = vtanh.f32 %v754_v38 }
 0x285   : > { %v756_v40 = vpop.f32.mrf.mxu3 }
 0x286   : > { %v1777_v41 = vpop.eup %1776  ;;  %v757_v43 = vadd.f32 %v2036_v23, %v756_v40 }
 0x287   : > { %v799_v42 = vpack.c.bf16 %v1777_v41, %v1775_v39 }
 0x288   : > { %1778 = vtanh.f32 %v757_v43 }
 0x289   : > { %890 = vmatmul.bf16.gmra.mxu0 %v799_v42 }
 0x28d   : > { %v758_v44 = vpop.f32.mrf.mxu3 }
 0x28e   : > { %v759_v45 = vadd.f32 %v2036_v23, %v758_v44  ;;  %v1779_v46 = vpop.eup %1778  ;;  %v1625_v44 = vld [vmem:[#allocation2 + $0x178] sm:$0xff] }
 0x28f   : > { %1186 = vmatpush.bf16.msrb.mxu2 %v1625_v44 }
 0x290   : > { %1780 = vtanh.f32 %v759_v45 }
 0x295   : > { %v761_v47 = vpop.f32.mrf.mxu3 }
 0x296   : > { %v1781_v48 = vpop.eup %1780  ;;  %v762_v50 = vadd.f32 %v2036_v23, %v761_v47 }
 0x297   : > { %v800_v49 = vpack.c.bf16 %v1781_v48, %v1779_v46 }
 0x298   : > { %1782 = vtanh.f32 %v762_v50 }
 0x299   : > { %895 = vmatmul.bf16.gmra.mxu0 %v800_v49 }
 0x29d   : > { %v763_v51 = vpop.f32.mrf.mxu3 }
 0x29e   : > { %v764_v52 = vadd.f32 %v2036_v23, %v763_v51  ;;  %v1783_v53 = vpop.eup %1782 }
 0x2a0   : > { %1784 = vtanh.f32 %v764_v52 }
 0x2a5   : > { %v766_v54 = vpop.f32.mrf.mxu3 }
 0x2a6   : > { %v1785_v55 = vpop.eup %1784  ;;  %v767_v57 = vadd.f32 %v2036_v23, %v766_v54 }
 0x2a7   : > { %v801_v56 = vpack.c.bf16 %v1785_v55, %v1783_v53  ;;  %v1624_v53 = vld [vmem:[#allocation2 + $0x170] sm:$0xff] }
 0x2a8   : > { %1786 = vtanh.f32 %v767_v57  ;;  %1187 = vmatpush.bf16.msrb.mxu2 %v1624_v53  ;;  %v1623_v57 = vld [vmem:[#allocation2 + $0x168] sm:$0xff] }
 0x2a9   : > { %900 = vmatmul.bf16.gmra.mxu0 %v801_v56 }
 0x2ac   : > { %1188 = vmatpush.bf16.msrb.mxu2 %v1623_v57 }
 0x2ad   : > { %v768_v58 = vpop.f32.mrf.mxu3 }
 0x2ae   : > { %v769_v59 = vadd.f32 %v2036_v23, %v768_v58  ;;  %v1787_v63 = vpop.eup %1786 }
 0x2b0   : > { %1788 = vtanh.f32 %v769_v59  ;;  %1189 = vmatpush.bf16.msrb.mxu2 %v1622_v3 }
 0x2b5   : > { %v771_v0 = vpop.f32.mrf.mxu3 }
 0x2b6   : > { %v1789_v1 = vpop.eup %1788  ;;  %v772_v4 = vadd.f32 %v2036_v23, %v771_v0 }
 0x2b7   : > { %v802_v2 = vpack.c.bf16 %v1789_v1, %v1787_v63 }
 0x2b8   : > { %1790 = vtanh.f32 %v772_v4 }
 0x2b9   : > { %905 = vmatmul.bf16.gmra.mxu0 %v802_v2 }
 0x2bd   : > { %v773_v5 = vpop.f32.mrf.mxu3 }
 0x2be   : > { %v774_v6 = vadd.f32 %v2036_v23, %v773_v5  ;;  %v1791_v9 = vpop.eup %1790 }
 0x2c0   : > { %1792 = vtanh.f32 %v774_v6 }
 0x2c5   : > { %v776_v10 = vpop.f32.mrf.mxu3 }
 0x2c6   : > { %v1793_v11 = vpop.eup %1792  ;;  %v777_v15 = vadd.f32 %v2036_v23, %v776_v10 }
 0x2c7   : > { %v803_v13 = vpack.c.bf16 %v1793_v11, %v1791_v9  ;;  %v1621_v11 = vld [vmem:[#allocation2 + $0x158] sm:$0xff] }
 0x2c8   : > { %1794 = vtanh.f32 %v777_v15  ;;  %1190 = vmatpush.bf16.msrb.mxu2 %v1621_v11 }
 0x2c9   : > { %910 = vmatmul.bf16.gmra.mxu0 %v803_v13 }
 0x2cc   : > { %1191 = vmatpush.bf16.msrb.mxu2 %v1620_v14 }
 0x2cd   : > { %v778_v16 = vpop.f32.mrf.mxu3 }
 0x2ce   : > { %v779_v17 = vadd.f32 %v2036_v23, %v778_v16  ;;  %v1795_v19 = vpop.eup %1794  ;;  %v2061_v23 = vand.u32 127, %v375_v21 }
 0x2d0   : > { %1796 = vtanh.f32 %v779_v17  ;;  %vm377_vm1 = vcmp.lt.s32.totalorder %v2061_v23, 80 }
 0x2d6   : > { %v1797_v18 = vpop.eup %1796 }
 0x2d7   : > { %v804_v22 = vpack.c.bf16 %v1797_v18, %v1795_v19 }
 0x2d9   : > { %915 = vmatmul.bf16.gmra.mxu0 %v804_v22 }
 0x2da   : > { %v881_v24 = vpop.f32.mrf.mxu0 }
 0x2db   : > { %v882_v25 = vadd.f32 %v2057_v20, %v881_v24 }
 0x2dd   : > { %1798 = vtanh.f32 %v882_v25 }
 0x2e2   : > { %v883_v26 = vpop.f32.mrf.mxu0 }
 0x2e3   : > { %v884_v27 = vadd.f32 %v2057_v20, %v883_v26  ;;  %v1799_v28 = vpop.eup %1798 }
 0x2e4   : > { %v939_v31 = vsel %vm377_vm1, %v1799_v28, %v882_v25 }
 0x2e5   : > { %1800 = vtanh.f32 %v884_v27 }
 0x2ea   : > { %v886_v29 = vpop.f32.mrf.mxu0 }
 0x2eb   : > { %v1801_v30 = vpop.eup %1800  ;;  %v887_v34 = vadd.f32 %v2057_v20, %v886_v29  ;;  %v1619_v29 = vld [vmem:[#allocation2 + $0x148] sm:$0xff] }
 0x2ec   : > { %v940_v32 = vsel %vm377_vm1, %v1801_v30, %v884_v27  ;;  %1192 = vmatpush.bf16.msrb.mxu2 %v1619_v29 }
 0x2ed   : > { %v955_v33 = vpack.c.bf16 %v940_v32, %v939_v31  ;;  %1802 = vtanh.f32 %v887_v34 }
 0x2ef   : > { %1038 = vmatmul.bf16.vlgmr.msra.gmra.mxu1 %v955_v33 }
 0x2f2   : > { %v888_v35 = vpop.f32.mrf.mxu0 }
 0x2f3   : > { %v889_v36 = vadd.f32 %v2057_v20, %v888_v35  ;;  %v1803_v37 = vpop.eup %1802 }
 0x2f4   : > { %v941_v39 = vsel %vm377_vm1, %v1803_v37, %v887_v34  ;;  %v1618_v34 = vld [vmem:[#allocation2 + $0x140] sm:$0xff] }
 0x2f5   : > { %1804 = vtanh.f32 %v889_v36  ;;  %1193 = vmatpush.bf16.msrb.mxu2 %v1618_v34 }
 0x2fb   : > { %v1805_v38 = vpop.eup %1804 }
 0x2fc   : > { %v942_v40 = vsel %vm377_vm1, %v1805_v38, %v889_v36 }
 0x2fd   : > { %v956_v41 = vpack.c.bf16 %v942_v40, %v941_v39 }
 0x2ff   : > { %1043 = vmatmul.bf16.gmra.mxu1 %v956_v41 }
 0x306   : > { %v891_v42 = vpop.f32.mrf.mxu0 }
 0x307   : > { %v892_v43 = vadd.f32 %v2057_v20, %v891_v42 }
 0x309   : > { %1806 = vtanh.f32 %v892_v43 }
 0x30e   : > { %v893_v45 = vpop.f32.mrf.mxu0 }
 0x30f   : > { %v894_v46 = vadd.f32 %v2057_v20, %v893_v45  ;;  %v1807_v47 = vpop.eup %1806 }
 0x310   : > { %v943_v50 = vsel %vm377_vm1, %v1807_v47, %v892_v43  ;;  %v2113_v43 = vld [vmem:[%s2210_s3 + $0x5] ss:$0 sm:$0xff] }
 0x311   : > { %1808 = vtanh.f32 %v894_v46 }
 0x316   : > { %v896_v48 = vpop.f32.mrf.mxu0 }
 0x317   : > { %v1809_v49 = vpop.eup %1808  ;;  %v897_v54 = vadd.f32 %v2057_v20, %v896_v48 }
 0x318   : > { %v944_v51 = vsel %vm377_vm1, %v1809_v49, %v894_v46 }
 0x319   : > { %v957_v52 = vpack.c.bf16 %v944_v51, %v943_v50  ;;  %1810 = vtanh.f32 %v897_v54 }
 0x31b   : > { %1048 = vmatmul.bf16.gmra.mxu1 %v957_v52 }
 0x31e   : > { %v898_v55 = vpop.f32.mrf.mxu0 }
 0x31f   : > { %v899_v56 = vadd.f32 %v2057_v20, %v898_v55  ;;  %v1811_v58 = vpop.eup %1810 }
 0x320   : > { %v945_v61 = vsel %vm377_vm1, %v1811_v58, %v897_v54 }
 0x321   : > { %1812 = vtanh.f32 %v899_v56 }
 0x326   : > { %v901_v59 = vpop.f32.mrf.mxu0 }
 0x327   : > { %v1813_v60 = vpop.eup %1812  ;;  %v902_v0 = vadd.f32 %v2057_v20, %v901_v59 }
 0x328   : > { %v946_v62 = vsel %vm377_vm1, %v1813_v60, %v899_v56 }
 0x329   : > { %v958_v63 = vpack.c.bf16 %v946_v62, %v945_v61  ;;  %1814 = vtanh.f32 %v902_v0 }
 0x32b   : > { %1053 = vmatmul.bf16.gmra.mxu1 %v958_v63 }
 0x32e   : > { %v903_v1 = vpop.f32.mrf.mxu0 }
 0x32f   : > { %v904_v2 = vadd.f32 %v2057_v20, %v903_v1  ;;  %v1815_v4 = vpop.eup %1814 }
 0x330   : > { %v947_v7 = vsel %vm377_vm1, %v1815_v4, %v902_v0 }
 0x331   : > { %1816 = vtanh.f32 %v904_v2 }
 0x336   : > { %v906_v5 = vpop.f32.mrf.mxu0 }
 0x337   : > { %v1817_v6 = vpop.eup %1816  ;;  %v907_v10 = vadd.f32 %v2057_v20, %v906_v5 }
 0x338   : > { %v948_v8 = vsel %vm377_vm1, %v1817_v6, %v904_v2 }
 0x339   : > { %v959_v9 = vpack.c.bf16 %v948_v8, %v947_v7  ;;  %1818 = vtanh.f32 %v907_v10 }
 0x33b   : > { %1058 = vmatmul.bf16.gmra.mxu1 %v959_v9 }
 0x33e   : > { %v908_v12 = vpop.f32.mrf.mxu0 }
 0x33f   : > { %v909_v13 = vadd.f32 %v2057_v20, %v908_v12  ;;  %v1819_v15 = vpop.eup %1818 }
 0x340   : > { %v949_v19 = vsel %vm377_vm1, %v1819_v15, %v907_v10 }
 0x341   : > { %1820 = vtanh.f32 %v909_v13 }
 0x346   : > { %v911_v16 = vpop.f32.mrf.mxu0 }
 0x347   : > { %v1821_v17 = vpop.eup %1820  ;;  %v912_v24 = vadd.f32 %v2057_v20, %v911_v16 }
 0x348   : > { %v950_v18 = vsel %vm377_vm1, %v1821_v17, %v909_v13 }
 0x349   : > { %v960_v22 = vpack.c.bf16 %v950_v18, %v949_v19  ;;  %1822 = vtanh.f32 %v912_v24 }
 0x34b   : > { %1063 = vmatmul.bf16.gmra.mxu1 %v960_v22 }
 0x34e   : > { %v913_v25 = vpop.f32.mrf.mxu0 }
 0x34f   : > { %v914_v21 = vadd.f32 %v2057_v20, %v913_v25  ;;  %v1823_v26 = vpop.eup %1822 }
 0x350   : > { %v951_v30 = vsel %vm377_vm1, %v1823_v26, %v912_v24 }
 0x351   : > { %1824 = vtanh.f32 %v914_v21 }
 0x356   : > { %v916_v27 = vpop.f32.mrf.mxu0 }
 0x357   : > { %v1825_v28 = vpop.eup %1824  ;;  %v917_v33 = vadd.f32 %v2057_v20, %v916_v27 }
 0x358   : > { %v952_v31 = vsel %vm377_vm1, %v1825_v28, %v914_v21 }
 0x359   : > { %v961_v32 = vpack.c.bf16 %v952_v31, %v951_v30  ;;  %1826 = vtanh.f32 %v917_v33 }
 0x35b   : > { %1068 = vmatmul.bf16.gmra.mxu1 %v961_v32 }
 0x35e   : > { %v918_v35 = vpop.f32.mrf.mxu0 }
 0x35f   : > { %v919_v36 = vadd.f32 %v2057_v20, %v918_v35  ;;  %v1827_v37 = vpop.eup %1826 }
 0x360   : > { %v953_v39 = vsel %vm377_vm1, %v1827_v37, %v917_v33 }
 0x361   : > { %1828 = vtanh.f32 %v919_v36 }
 0x367   : > { %v1829_v38 = vpop.eup %1828 }
 0x368   : > { %v954_v40 = vsel %vm377_vm1, %v1829_v38, %v919_v36 }
 0x369   : > { %v962_v41 = vpack.c.bf16 %v954_v40, %v953_v39 }
 0x36b   : > { %1073 = vmatmul.bf16.gmra.mxu1 %v962_v41 }
 0x36c   : > { %v1039_v42 = vpop.f32.mrf.mxu1 }
 0x36d   : > { %v1040_v44 = vadd.f32 %v2113_v43, %v1039_v42 }
 0x36f   : > { %1830 = vtanh.f32 %v1040_v44 }
 0x374   : > { %v1041_v20 = vpop.f32.mrf.mxu1 }
 0x375   : > { %v1042_v45 = vadd.f32 %v2113_v43, %v1041_v20  ;;  %v1831_v46 = vpop.eup %1830 }
 0x376   : > { %v1095_v49 = vsel %vm377_vm1, %v1831_v46, %v1040_v44 }
 0x377   : > { %1832 = vtanh.f32 %v1042_v45 }
 0x37c   : > { %v1044_v47 = vpop.f32.mrf.mxu1 }
 0x37d   : > { %v1833_v48 = vpop.eup %1832  ;;  %v1045_v52 = vadd.f32 %v2113_v43, %v1044_v47 }
 0x37e   : > { %v1096_v50 = vsel %vm377_vm1, %v1833_v48, %v1042_v45 }
 0x37f   : > { %v1111_v51 = vpack.c.bf16 %v1096_v50, %v1095_v49  ;;  %1834 = vtanh.f32 %v1045_v52 }
 0x381   : > { %1194 = vmatmul.bf16.vlgmr.msrb.gmra.mxu2 %v1111_v51 }
 0x384   : > { %v1046_v53 = vpop.f32.mrf.mxu1 }
 0x385   : > { %v1047_v54 = vadd.f32 %v2113_v43, %v1046_v53  ;;  %v1835_v55 = vpop.eup %1834 }
 0x386   : > { %v1097_v57 = vsel %vm377_vm1, %v1835_v55, %v1045_v52  ;;  %v1669_v52 = vld [vmem:[%s2210_s3 + $0x6] ss:$0 sm:$0xff] }
 0x387   : > { %1836 = vtanh.f32 %v1047_v54 }
 0x38d   : > { %v1837_v56 = vpop.eup %1836 }
 0x38e   : > { %v1098_v58 = vsel %vm377_vm1, %v1837_v56, %v1047_v54 }
 0x38f   : > { %v1112_v59 = vpack.c.bf16 %v1098_v58, %v1097_v57 }
 0x391   : > { %1199 = vmatmul.bf16.gmra.mxu2 %v1112_v59 }
 0x398   : > { %v1049_v60 = vpop.f32.mrf.mxu1 }
 0x399   : > { %v1050_v61 = vadd.f32 %v2113_v43, %v1049_v60 }
 0x39b   : > { %1838 = vtanh.f32 %v1050_v61 }
 0x3a0   : > { %v1051_v62 = vpop.f32.mrf.mxu1 }
 0x3a1   : > { %v1052_v63 = vadd.f32 %v2113_v43, %v1051_v62  ;;  %v1839_v0 = vpop.eup %1838 }
 0x3a2   : > { %v1099_v3 = vsel %vm377_vm1, %v1839_v0, %v1050_v61 }
 0x3a3   : > { %1840 = vtanh.f32 %v1052_v63 }
 0x3a8   : > { %v1054_v1 = vpop.f32.mrf.mxu1 }
 0x3a9   : > { %v1841_v2 = vpop.eup %1840  ;;  %v1055_v6 = vadd.f32 %v2113_v43, %v1054_v1 }
 0x3aa   : > { %v1100_v4 = vsel %vm377_vm1, %v1841_v2, %v1052_v63 }
 0x3ab   : > { %v1113_v5 = vpack.c.bf16 %v1100_v4, %v1099_v3  ;;  %1842 = vtanh.f32 %v1055_v6 }
 0x3ad   : > { %1204 = vmatmul.bf16.gmra.mxu2 %v1113_v5 }
 0x3b0   : > { %v1056_v7 = vpop.f32.mrf.mxu1 }
 0x3b1   : > { %v1057_v8 = vadd.f32 %v2113_v43, %v1056_v7  ;;  %v1843_v9 = vpop.eup %1842 }
 0x3b2   : > { %v1101_v12 = vsel %vm377_vm1, %v1843_v9, %v1055_v6 }
 0x3b3   : > { %1844 = vtanh.f32 %v1057_v8 }
 0x3b8   : > { %v1059_v10 = vpop.f32.mrf.mxu1 }
 0x3b9   : > { %v1845_v11 = vpop.eup %1844  ;;  %v1060_v15 = vadd.f32 %v2113_v43, %v1059_v10 }
 0x3ba   : > { %v1102_v13 = vsel %vm377_vm1, %v1845_v11, %v1057_v8 }
 0x3bb   : > { %v1114_v14 = vpack.c.bf16 %v1102_v13, %v1101_v12  ;;  %1846 = vtanh.f32 %v1060_v15 }
 0x3bd   : > { %1209 = vmatmul.bf16.gmra.mxu2 %v1114_v14 }
 0x3c0   : > { %v1061_v16 = vpop.f32.mrf.mxu1 }
 0x3c1   : > { %v1062_v17 = vadd.f32 %v2113_v43, %v1061_v16  ;;  %v1847_v19 = vpop.eup %1846 }
 0x3c2   : > { %v1103_v24 = vsel %vm377_vm1, %v1847_v19, %v1060_v15 }
 0x3c3   : > { %1848 = vtanh.f32 %v1062_v17 }
 0x3c8   : > { %v1064_v18 = vpop.f32.mrf.mxu1 }
 0x3c9   : > { %v1849_v22 = vpop.eup %1848  ;;  %v1065_v26 = vadd.f32 %v2113_v43, %v1064_v18 }
 0x3ca   : > { %v1104_v25 = vsel %vm377_vm1, %v1849_v22, %v1062_v17 }
 0x3cb   : > { %v1115_v21 = vpack.c.bf16 %v1104_v25, %v1103_v24  ;;  %1850 = vtanh.f32 %v1065_v26 }
 0x3cd   : > { %1214 = vmatmul.bf16.gmra.mxu2 %v1115_v21 }
 0x3d0   : > { %v1066_v27 = vpop.f32.mrf.mxu1 }
 0x3d1   : > { %v1067_v28 = vadd.f32 %v2113_v43, %v1066_v27  ;;  %v1851_v29 = vpop.eup %1850 }
 0x3d2   : > { %v1105_v32 = vsel %vm377_vm1, %v1851_v29, %v1065_v26 }
 0x3d3   : > { %1852 = vtanh.f32 %v1067_v28 }
 0x3d8   : > { %v1069_v30 = vpop.f32.mrf.mxu1 }
 0x3d9   : > { %v1853_v31 = vpop.eup %1852  ;;  %v1070_v35 = vadd.f32 %v2113_v43, %v1069_v30 }
 0x3da   : > { %v1106_v33 = vsel %vm377_vm1, %v1853_v31, %v1067_v28 }
 0x3db   : > { %v1116_v34 = vpack.c.bf16 %v1106_v33, %v1105_v32  ;;  %1854 = vtanh.f32 %v1070_v35 }
 0x3dd   : > { %1219 = vmatmul.bf16.gmra.mxu2 %v1116_v34 }
 0x3e0   : > { %v1071_v36 = vpop.f32.mrf.mxu1 }
 0x3e1   : > { %v1072_v37 = vadd.f32 %v2113_v43, %v1071_v36  ;;  %v1855_v38 = vpop.eup %1854 }
 0x3e2   : > { %v1107_v41 = vsel %vm377_vm1, %v1855_v38, %v1070_v35 }
 0x3e3   : > { %1856 = vtanh.f32 %v1072_v37 }
 0x3e8   : > { %v1074_v39 = vpop.f32.mrf.mxu1 }
 0x3e9   : > { %v1857_v40 = vpop.eup %1856  ;;  %v1075_v20 = vadd.f32 %v2113_v43, %v1074_v39 }
 0x3ea   : > { %v1108_v42 = vsel %vm377_vm1, %v1857_v40, %v1072_v37 }
 0x3eb   : > { %v1117_v44 = vpack.c.bf16 %v1108_v42, %v1107_v41  ;;  %1858 = vtanh.f32 %v1075_v20 }
 0x3ed   : > { %1224 = vmatmul.bf16.gmra.mxu2 %v1117_v44 }
 0x3f0   : > { %v1076_v45 = vpop.f32.mrf.mxu1 }
 0x3f1   : > { %v1077_v46 = vadd.f32 %v2113_v43, %v1076_v45  ;;  %v1859_v47 = vpop.eup %1858 }
 0x3f2   : > { %v1109_v49 = vsel %vm377_vm1, %v1859_v47, %v1075_v20 }
 0x3f3   : > { %1860 = vtanh.f32 %v1077_v46 }
 0x3f9   : > { %v1861_v48 = vpop.eup %1860 }
 0x3fa   : > { %v1110_v50 = vsel %vm377_vm1, %v1861_v48, %v1077_v46 }
 0x3fb   : > { %v1118_v51 = vpack.c.bf16 %v1110_v50, %v1109_v49 }
 0x3fd   : > { %1229 = vmatmul.bf16.gmra.mxu2 %v1118_v51 }
 0x404   : > { %v1195_v43 = vpop.f32.mrf.mxu2 }
 0x405   : > { %v1196_v23 = vadd.f32 %v1669_v52, %v1195_v43 }
 0x407   : > { %1236 = vst.msk [vmem:[%s2170_s23] sm:$0xff] %vm1235_vm2, %v1196_v23 }
 0x40c   : > { %v1197_v53 = vpop.f32.mrf.mxu2 }
 0x40d   : > { %v1198_v54 = vadd.f32 %v1669_v52, %v1197_v53 }
 0x40f   : > { %1237 = vst.msk [vmem:[%s2170_s23 + $0x8] sm:$0xff] %vm1235_vm2, %v1198_v54 }
 0x414   : > { %v1200_v55 = vpop.f32.mrf.mxu2 }
 0x415   : > { %v1201_v56 = vadd.f32 %v1669_v52, %v1200_v55 }
 0x417   : > { %1238 = vst.msk [vmem:[%s2170_s23 + $0x10] sm:$0xff] %vm1235_vm2, %v1201_v56 }
 0x41c   : > { %v1202_v57 = vpop.f32.mrf.mxu2 }
 0x41d   : > { %v1203_v58 = vadd.f32 %v1669_v52, %v1202_v57 }
 0x41f   : > { %1239 = vst.msk [vmem:[%s2170_s23 + $0x18] sm:$0xff] %vm1235_vm2, %v1203_v58 }
 0x430   : > { %v1205_v59 = vpop.f32.mrf.mxu2 }
 0x431   : > { %v1206_v60 = vadd.f32 %v1669_v52, %v1205_v59 }
 0x433   : > { %1240 = vst.msk [vmem:[%s2170_s23 + $0x20] sm:$0xff] %vm1235_vm2, %v1206_v60 }
 0x438   : > { %v1207_v61 = vpop.f32.mrf.mxu2 }
 0x439   : > { %v1208_v62 = vadd.f32 %v1669_v52, %v1207_v61 }
 0x43b   : > { %1241 = vst.msk [vmem:[%s2170_s23 + $0x28] sm:$0xff] %vm1235_vm2, %v1208_v62 }
 0x440   : > { %v1210_v63 = vpop.f32.mrf.mxu2 }
 0x441   : > { %v1211_v0 = vadd.f32 %v1669_v52, %v1210_v63 }
 0x443   : > { %1242 = vst.msk [vmem:[%s2170_s23 + $0x30] sm:$0xff] %vm1235_vm2, %v1211_v0 }
 0x448   : > { %v1212_v1 = vpop.f32.mrf.mxu2 }
 0x449   : > { %v1213_v2 = vadd.f32 %v1669_v52, %v1212_v1 }
 0x44b   : > { %1243 = vst.msk [vmem:[%s2170_s23 + $0x38] sm:$0xff] %vm1235_vm2, %v1213_v2 }
 0x450   : > { %v1215_v3 = vpop.f32.mrf.mxu2 }
 0x451   : > { %v1216_v4 = vadd.f32 %v1669_v52, %v1215_v3 }
 0x453   : > { %1244 = vst.msk [vmem:[%s2170_s23 + $0x40] sm:$0xff] %vm1235_vm2, %v1216_v4 }
 0x458   : > { %v1217_v5 = vpop.f32.mrf.mxu2 }
 0x459   : > { %v1218_v6 = vadd.f32 %v1669_v52, %v1217_v5 }
 0x45b   : > { %1245 = vst.msk [vmem:[%s2170_s23 + $0x48] sm:$0xff] %vm1235_vm2, %v1218_v6 }
 0x460   : > { %v1220_v7 = vpop.f32.mrf.mxu2 }
 0x461   : > { %v1221_v8 = vadd.f32 %v1669_v52, %v1220_v7 }
 0x463   : > { %1246 = vst.msk [vmem:[%s2170_s23 + $0x50] sm:$0xff] %vm1235_vm2, %v1221_v8 }
 0x468   : > { %v1222_v9 = vpop.f32.mrf.mxu2 }
 0x469   : > { %v1223_v10 = vadd.f32 %v1669_v52, %v1222_v9 }
 0x46b   : > { %1247 = vst.msk [vmem:[%s2170_s23 + $0x58] sm:$0xff] %vm1235_vm2, %v1223_v10 }
 0x470   : > { %v1225_v11 = vpop.f32.mrf.mxu2 }
 0x471   : > { %v1226_v12 = vadd.f32 %v1669_v52, %v1225_v11 }
 0x473   : > { %1248 = vst.msk [vmem:[%s2170_s23 + $0x60] sm:$0xff] %vm1235_vm2, %v1226_v12 }
 0x478   : > { %v1227_v13 = vpop.f32.mrf.mxu2 }
 0x479   : > { %v1228_v14 = vadd.f32 %v1669_v52, %v1227_v13 }
 0x47b   : > { %1249 = vst.msk [vmem:[%s2170_s23 + $0x68] sm:$0xff] %vm1235_vm2, %v1228_v14 }
 0x480   : > { %v1230_v15 = vpop.f32.mrf.mxu2 }
 0x481   : > { %v1231_v16 = vadd.f32 %v1669_v52, %v1230_v15 }
 0x483   : > { %1250 = vst.msk [vmem:[%s2170_s23 + $0x70] sm:$0xff] %vm1235_vm2, %v1231_v16 }
 0x488   : > { %v1232_v17 = vpop.f32.mrf.mxu2 }
 0x489   : > { %v1233_v19 = vadd.f32 %v1669_v52, %v1232_v17 }
 0x48b   : > { %1251 = vst.msk [vmem:[%s2170_s23 + $0x78] sm:$0xff] %vm1235_vm2, %v1233_v19 }
 0x48c PF: > { %s15_s15 = sadd.s32 1, %s1902_s15  }
 0x48d   : > { %p12_p7 = scmp.ge.s32.totalorder %s15_s15, 4  }
 0x48f   :  { %14 = sbr.rel (!%p12_p7) target bundleno = 1 (0x1), region = 76 }
 0x494   :  { %1274 = vsyncpa [#allocation3], 1 }
 0x495   :  { %1276 = vsyncpa [#allocation3 + $0x1], 1 }

</bundles_post_ra>
